<compile_context>
chip_gen: v7x
topology: tpu7x:2x2x1
jax: 0.10.0
libtpu: 0.0.40
codegen_flags: <defaults>
</compile_context>

<pallas_src>
import functools

import jax
import jax.numpy as jnp
from jax.experimental import pallas as pl
from jax.experimental.pallas import tpu as pltpu

NUM_CLASSES = 10
HIDDEN_CONV = 100
HIDDEN_FC = 50


def _parm_kernel(x_ref, wc_ref, bc_ref, w1_ref, b1_ref, w2_ref, b2_ref,
                 out_ref, *, tile_h, width, channels):
    # x_ref: (H+2, W+2, C) padded bf16 image of the current batch element
    #        (resident across the row-block grid axis).
    # out_ref: (NUM_CLASSES, tile_h * W) f32, transposed (NCHW-ready) output.
    row0 = pl.program_id(1) * tile_h
    # (tile_h + 2, W + 2, C) slab with a 1-row halo on each side.
    slab = x_ref[pl.ds(row0, tile_h + 2)]
    npix = tile_h * width

    # 3x3 conv (padding=1) as 9 accumulating GEMMs: (npix, C) @ (C, 100),
    # f32 accumulation on the MXU.
    acc = jnp.zeros((npix, HIDDEN_CONV), jnp.float32)
    for ky in range(3):
        for kx in range(3):
            tap = slab[ky:ky + tile_h, kx:kx + width, :].reshape(npix, channels)
            acc = acc + jnp.dot(tap, wc_ref[ky * 3 + kx],
                                preferred_element_type=jnp.float32)
    h = jnp.maximum(acc + bc_ref[...], 0.0).astype(jnp.bfloat16)

    # Linear(100 -> 50) + ReLU.
    h1 = jnp.dot(h, w1_ref[...], preferred_element_type=jnp.float32) + b1_ref[...]
    h1 = jnp.maximum(h1, 0.0).astype(jnp.bfloat16)

    # Linear(50 -> NUM_CLASSES), computed transposed so the lane axis is the
    # pixel axis: logits_T (10, npix) = w2 (10, 50) . h1 (npix, 50)^T.
    logits_t = jax.lax.dot_general(
        w2_ref[...], h1,
        dimension_numbers=(((1,), (1,)), ((), ())),
        preferred_element_type=jnp.float32)
    out_ref[...] = logits_t + b2_ref[...]


def _pick_tile_h(h, w, target_rows):
    """Largest row-tile whose pixel count divides evenly and keeps the output
    block lane dim either a multiple of 128 or the full H*W extent."""
    legal = [th for th in range(1, h + 1)
             if h % th == 0 and ((th * w) % 128 == 0 or th == h)]
    cap = max(1, target_rows // w)
    under = [th for th in legal if th <= cap]
    return max(under) if under else min(legal)


@functools.partial(jax.jit, static_argnames=("target_rows",))
def parm_forward(x, params, target_rows=1024):
    """x: (B, C, H, W) float32.  Returns (B, NUM_CLASSES, H, W) float32."""
    B, C, H, W = x.shape
    wc, bc, w1, b1, w2, b2 = params

    tile_h = _pick_tile_h(H, W, target_rows)
    n_h = H // tile_h
    npix = tile_h * W

    # Zero-pad spatially (conv padding=1), go NHWC, cast to bf16 for the MXU.
    xpad = jnp.pad(x, ((0, 0), (0, 0), (1, 1), (1, 1)))
    xpad = xpad.transpose(0, 2, 3, 1).astype(jnp.bfloat16)       # (B, H+2, W+2, C)

    # Conv weight (100, C, 3, 3) -> (9, C, 100), tap index t = ky*3 + kx.
    wc9 = wc.transpose(2, 3, 1, 0).reshape(9, C, HIDDEN_CONV).astype(jnp.bfloat16)
    w1m = w1.T.astype(jnp.bfloat16)                              # (100, 50)
    w2m = w2.astype(jnp.bfloat16)                                # (10, 50)
    bc_r = bc.reshape(1, HIDDEN_CONV).astype(jnp.float32)
    b1_r = b1.reshape(1, HIDDEN_FC).astype(jnp.float32)
    b2_c = b2.reshape(NUM_CLASSES, 1).astype(jnp.float32)

    kernel = functools.partial(_parm_kernel, tile_h=tile_h, width=W, channels=C)

    flops = 2 * B * H * W * (9 * C * HIDDEN_CONV
                             + HIDDEN_CONV * HIDDEN_FC
                             + HIDDEN_FC * NUM_CLASSES)
    bytes_accessed = (xpad.size * 2 + wc9.size * 2 + w1m.size * 2 + w2m.size * 2
                      + (bc_r.size + b1_r.size + b2_c.size) * 4
                      + B * NUM_CLASSES * H * W * 4)

    out = pl.pallas_call(
        kernel,
        out_shape=jax.ShapeDtypeStruct((B, NUM_CLASSES, H * W), jnp.float32),
        grid_spec=pltpu.PrefetchScalarGridSpec(
            num_scalar_prefetch=0,
            grid=(B, n_h),
            in_specs=[
                # Whole padded image of batch b; block index ignores the row
                # axis, so it is fetched once per batch and stays resident.
                pl.BlockSpec((None, H + 2, W + 2, C), lambda b, i: (b, 0, 0, 0)),
                pl.BlockSpec((9, C, HIDDEN_CONV), lambda b, i: (0, 0, 0)),
                pl.BlockSpec((1, HIDDEN_CONV), lambda b, i: (0, 0)),
                pl.BlockSpec((HIDDEN_CONV, HIDDEN_FC), lambda b, i: (0, 0)),
                pl.BlockSpec((1, HIDDEN_FC), lambda b, i: (0, 0)),
                pl.BlockSpec((NUM_CLASSES, HIDDEN_FC), lambda b, i: (0, 0)),
                pl.BlockSpec((NUM_CLASSES, 1), lambda b, i: (0, 0)),
            ],
            out_specs=pl.BlockSpec((None, NUM_CLASSES, npix),
                                   lambda b, i: (b, 0, i)),
        ),
        compiler_params=pltpu.CompilerParams(
            dimension_semantics=("parallel", "parallel")),
        cost_estimate=pl.CostEstimate(flops=flops, transcendentals=0,
                                      bytes_accessed=bytes_accessed),
    )(xpad, wc9, bc_r, w1m, b1_r, w2m, b2_c)

    # Already (B, NUM_CLASSES, H*W) in NCHW pixel order -> free reshape.
    return out.reshape(B, NUM_CLASSES, H, W)


def init_params(key, inchannel):
    """Deterministic parameter init with the same shapes as the PyTorch module."""
    ks = jax.random.split(key, 6)
    wc = jax.random.normal(ks[0], (HIDDEN_CONV, inchannel, 3, 3),
                           jnp.float32) * 0.1
    bc = jax.random.normal(ks[1], (HIDDEN_CONV,), jnp.float32) * 0.01
    w1 = jax.random.normal(ks[2], (HIDDEN_FC, HIDDEN_CONV), jnp.float32) * 0.1
    b1 = jax.random.normal(ks[3], (HIDDEN_FC,), jnp.float32) * 0.01
    w2 = jax.random.normal(ks[4], (NUM_CLASSES, HIDDEN_FC), jnp.float32) * 0.1
    b2 = jax.random.normal(ks[5], (NUM_CLASSES,), jnp.float32) * 0.01
    return (wc, bc, w1, b1, w2, b2)


def parm_reference(x, params):
    """Pure-JAX reference of the PyTorch forward (for sanity check)."""
    wc, bc, w1, b1, w2, b2 = params
    B, C, H, W = x.shape
    conv = jax.lax.conv_general_dilated(
        x, wc, window_strides=(1, 1), padding="SAME",
        dimension_numbers=("NCHW", "OIHW", "NCHW"))
    h = jnp.maximum(conv + bc[None, :, None, None], 0.0)         # (B, 100, H, W)
    h = h.reshape(B, HIDDEN_CONV, H * W).transpose(0, 2, 1)      # (B, HW, 100)
    h = jnp.maximum(h @ w1.T + b1, 0.0)
    o = h @ w2.T + b2                                            # (B, HW, 10)
    return o.transpose(0, 2, 1).reshape(B, NUM_CLASSES, H, W)


if __name__ == "__main__":
    key = jax.random.PRNGKey(0)
    k_x, k_p = jax.random.split(key)

    B, C, S = 2, 4, 16            # batch, inchannel, input_size
    x = jax.random.normal(k_x, (B, C, S, S), jnp.float32)
    params = init_params(k_p, C)

    out = parm_forward(x, params)
    out = jax.block_until_ready(out)
    assert out.shape == (B, NUM_CLASSES, S, S), out.shape

    # Reference with the same bf16 rounding of inputs/weights that the kernel
    # uses (accumulation stays f32 in both), so the tolerance stays tight.
    q = lambda a: a.astype(jnp.bfloat16).astype(jnp.float32)
    params_q = (q(params[0]), params[1], q(params[2]), params[3],
                q(params[4]), params[5])
    ref = parm_reference(q(x), params_q)
    assert jnp.allclose(out, ref, atol=5e-2, rtol=5e-2), (
        float(jnp.max(jnp.abs(out - ref))))

    print("KERNEL_OK")
</pallas_src>

<mosaic_0001>
module attributes {stable_mosaic.version = 11 : i64} {
  func.func @_parm_kernel(%arg0: i32, %arg1: i32, %arg2: memref<1x18x18x4xbf16, #tpu.memory_space<vmem>>, %arg3: memref<9x4x100xbf16, #tpu.memory_space<vmem>>, %arg4: memref<1x100xf32, #tpu.memory_space<vmem>>, %arg5: memref<100x50xbf16, #tpu.memory_space<vmem>>, %arg6: memref<1x50xf32, #tpu.memory_space<vmem>>, %arg7: memref<10x50xbf16, #tpu.memory_space<vmem>>, %arg8: memref<10x1xf32, #tpu.memory_space<vmem>>, %arg9: memref<1x10x256xf32, #tpu.memory_space<vmem>>) attributes {dimension_semantics = [#tpu.dimension_semantics<parallel>, #tpu.dimension_semantics<parallel>], iteration_bounds = array<i64: 2, 1>, scalar_prefetch = 0 : i64, scratch_operands = 0 : i64, tpu.core_type = #tpu.core_type<tc>, window_params = [{transform_indices = @transform_0, window_bounds = array<i64: 1, 18, 18, 4>}, {pipeline_mode = #tpu.pipeline_mode<synchronous>, transform_indices = @transform_1, window_bounds = array<i64: 9, 4, 100>}, {pipeline_mode = #tpu.pipeline_mode<synchronous>, transform_indices = @transform_2, window_bounds = array<i64: 1, 100>}, {pipeline_mode = #tpu.pipeline_mode<synchronous>, transform_indices = @transform_3, window_bounds = array<i64: 100, 50>}, {pipeline_mode = #tpu.pipeline_mode<synchronous>, transform_indices = @transform_4, window_bounds = array<i64: 1, 50>}, {pipeline_mode = #tpu.pipeline_mode<synchronous>, transform_indices = @transform_5, window_bounds = array<i64: 10, 50>}, {pipeline_mode = #tpu.pipeline_mode<synchronous>, transform_indices = @transform_6, window_bounds = array<i64: 10, 1>}, {transform_indices = @transform_7, window_bounds = array<i64: 1, 10, 256>}]} {
    %c16_i32 = arith.constant 16 : i32
    %0 = arith.muli %arg1, %c16_i32 : i32
    %c0 = arith.constant 0 : index
    %1 = arith.index_cast %0 : i32 to index
    %c0_0 = arith.constant 0 : index
    %c0_1 = arith.constant 0 : index
    %2 = vector.load %arg2[%c0, %1, %c0_0, %c0_1] : memref<1x18x18x4xbf16, #tpu.memory_space<vmem>>, vector<1x18x18x4xbf16>
    %3 = vector.shape_cast %2 : vector<1x18x18x4xbf16> to vector<18x18x4xbf16>
    %cst = arith.constant 0.000000e+00 : f32
    %4 = vector.broadcast %cst : f32 to vector<256x100xf32>
    %5 = vector.extract_strided_slice %3 {offsets = [0, 0, 0], sizes = [16, 16, 4], strides = [1, 1, 1]} : vector<18x18x4xbf16> to vector<16x16x4xbf16>
    %6 = vector.shape_cast %5 : vector<16x16x4xbf16> to vector<256x4xbf16>
    %c0_2 = arith.constant 0 : index
    %c0_3 = arith.constant 0 : index
    %c0_4 = arith.constant 0 : index
    %7 = vector.load %arg3[%c0_2, %c0_3, %c0_4] : memref<9x4x100xbf16, #tpu.memory_space<vmem>>, vector<1x4x100xbf16>
    %8 = vector.shape_cast %7 : vector<1x4x100xbf16> to vector<4x100xbf16>
    %cst_5 = arith.constant dense<0.000000e+00> : vector<256x100xf32>
    %9 = tpu.matmul %6, %8, %cst_5 {dimension_numbers = #tpu.dot_dimension_numbers<[1], [0], [0], [1], [0, 0, 1, 1], [], []>} : vector<256x4xbf16>, vector<4x100xbf16>, vector<256x100xf32> -> vector<256x100xf32>
    %10 = arith.addf %4, %9 : vector<256x100xf32>
    %11 = vector.extract_strided_slice %3 {offsets = [0, 1, 0], sizes = [16, 16, 4], strides = [1, 1, 1]} : vector<18x18x4xbf16> to vector<16x16x4xbf16>
    %12 = vector.shape_cast %11 : vector<16x16x4xbf16> to vector<256x4xbf16>
    %c1 = arith.constant 1 : index
    %c0_6 = arith.constant 0 : index
    %c0_7 = arith.constant 0 : index
    %13 = vector.load %arg3[%c1, %c0_6, %c0_7] : memref<9x4x100xbf16, #tpu.memory_space<vmem>>, vector<1x4x100xbf16>
    %14 = vector.shape_cast %13 : vector<1x4x100xbf16> to vector<4x100xbf16>
    %cst_8 = arith.constant dense<0.000000e+00> : vector<256x100xf32>
    %15 = tpu.matmul %12, %14, %cst_8 {dimension_numbers = #tpu.dot_dimension_numbers<[1], [0], [0], [1], [0, 0, 1, 1], [], []>} : vector<256x4xbf16>, vector<4x100xbf16>, vector<256x100xf32> -> vector<256x100xf32>
    %16 = arith.addf %10, %15 : vector<256x100xf32>
    %17 = vector.extract_strided_slice %3 {offsets = [0, 2, 0], sizes = [16, 16, 4], strides = [1, 1, 1]} : vector<18x18x4xbf16> to vector<16x16x4xbf16>
    %18 = vector.shape_cast %17 : vector<16x16x4xbf16> to vector<256x4xbf16>
    %c2 = arith.constant 2 : index
    %c0_9 = arith.constant 0 : index
    %c0_10 = arith.constant 0 : index
    %19 = vector.load %arg3[%c2, %c0_9, %c0_10] : memref<9x4x100xbf16, #tpu.memory_space<vmem>>, vector<1x4x100xbf16>
    %20 = vector.shape_cast %19 : vector<1x4x100xbf16> to vector<4x100xbf16>
    %cst_11 = arith.constant dense<0.000000e+00> : vector<256x100xf32>
    %21 = tpu.matmul %18, %20, %cst_11 {dimension_numbers = #tpu.dot_dimension_numbers<[1], [0], [0], [1], [0, 0, 1, 1], [], []>} : vector<256x4xbf16>, vector<4x100xbf16>, vector<256x100xf32> -> vector<256x100xf32>
    %22 = arith.addf %16, %21 : vector<256x100xf32>
    %23 = vector.extract_strided_slice %3 {offsets = [1, 0, 0], sizes = [16, 16, 4], strides = [1, 1, 1]} : vector<18x18x4xbf16> to vector<16x16x4xbf16>
    %24 = vector.shape_cast %23 : vector<16x16x4xbf16> to vector<256x4xbf16>
    %c3 = arith.constant 3 : index
    %c0_12 = arith.constant 0 : index
    %c0_13 = arith.constant 0 : index
    %25 = vector.load %arg3[%c3, %c0_12, %c0_13] : memref<9x4x100xbf16, #tpu.memory_space<vmem>>, vector<1x4x100xbf16>
    %26 = vector.shape_cast %25 : vector<1x4x100xbf16> to vector<4x100xbf16>
    %cst_14 = arith.constant dense<0.000000e+00> : vector<256x100xf32>
    %27 = tpu.matmul %24, %26, %cst_14 {dimension_numbers = #tpu.dot_dimension_numbers<[1], [0], [0], [1], [0, 0, 1, 1], [], []>} : vector<256x4xbf16>, vector<4x100xbf16>, vector<256x100xf32> -> vector<256x100xf32>
    %28 = arith.addf %22, %27 : vector<256x100xf32>
    %29 = vector.extract_strided_slice %3 {offsets = [1, 1, 0], sizes = [16, 16, 4], strides = [1, 1, 1]} : vector<18x18x4xbf16> to vector<16x16x4xbf16>
    %30 = vector.shape_cast %29 : vector<16x16x4xbf16> to vector<256x4xbf16>
    %c4 = arith.constant 4 : index
    %c0_15 = arith.constant 0 : index
    %c0_16 = arith.constant 0 : index
    %31 = vector.load %arg3[%c4, %c0_15, %c0_16] : memref<9x4x100xbf16, #tpu.memory_space<vmem>>, vector<1x4x100xbf16>
    %32 = vector.shape_cast %31 : vector<1x4x100xbf16> to vector<4x100xbf16>
    %cst_17 = arith.constant dense<0.000000e+00> : vector<256x100xf32>
    %33 = tpu.matmul %30, %32, %cst_17 {dimension_numbers = #tpu.dot_dimension_numbers<[1], [0], [0], [1], [0, 0, 1, 1], [], []>} : vector<256x4xbf16>, vector<4x100xbf16>, vector<256x100xf32> -> vector<256x100xf32>
    %34 = arith.addf %28, %33 : vector<256x100xf32>
    %35 = vector.extract_strided_slice %3 {offsets = [1, 2, 0], sizes = [16, 16, 4], strides = [1, 1, 1]} : vector<18x18x4xbf16> to vector<16x16x4xbf16>
    %36 = vector.shape_cast %35 : vector<16x16x4xbf16> to vector<256x4xbf16>
    %c5 = arith.constant 5 : index
    %c0_18 = arith.constant 0 : index
    %c0_19 = arith.constant 0 : index
    %37 = vector.load %arg3[%c5, %c0_18, %c0_19] : memref<9x4x100xbf16, #tpu.memory_space<vmem>>, vector<1x4x100xbf16>
    %38 = vector.shape_cast %37 : vector<1x4x100xbf16> to vector<4x100xbf16>
    %cst_20 = arith.constant dense<0.000000e+00> : vector<256x100xf32>
    %39 = tpu.matmul %36, %38, %cst_20 {dimension_numbers = #tpu.dot_dimension_numbers<[1], [0], [0], [1], [0, 0, 1, 1], [], []>} : vector<256x4xbf16>, vector<4x100xbf16>, vector<256x100xf32> -> vector<256x100xf32>
    %40 = arith.addf %34, %39 : vector<256x100xf32>
    %41 = vector.extract_strided_slice %3 {offsets = [2, 0, 0], sizes = [16, 16, 4], strides = [1, 1, 1]} : vector<18x18x4xbf16> to vector<16x16x4xbf16>
    %42 = vector.shape_cast %41 : vector<16x16x4xbf16> to vector<256x4xbf16>
    %c6 = arith.constant 6 : index
    %c0_21 = arith.constant 0 : index
    %c0_22 = arith.constant 0 : index
    %43 = vector.load %arg3[%c6, %c0_21, %c0_22] : memref<9x4x100xbf16, #tpu.memory_space<vmem>>, vector<1x4x100xbf16>
    %44 = vector.shape_cast %43 : vector<1x4x100xbf16> to vector<4x100xbf16>
    %cst_23 = arith.constant dense<0.000000e+00> : vector<256x100xf32>
    %45 = tpu.matmul %42, %44, %cst_23 {dimension_numbers = #tpu.dot_dimension_numbers<[1], [0], [0], [1], [0, 0, 1, 1], [], []>} : vector<256x4xbf16>, vector<4x100xbf16>, vector<256x100xf32> -> vector<256x100xf32>
    %46 = arith.addf %40, %45 : vector<256x100xf32>
    %47 = vector.extract_strided_slice %3 {offsets = [2, 1, 0], sizes = [16, 16, 4], strides = [1, 1, 1]} : vector<18x18x4xbf16> to vector<16x16x4xbf16>
    %48 = vector.shape_cast %47 : vector<16x16x4xbf16> to vector<256x4xbf16>
    %c7 = arith.constant 7 : index
    %c0_24 = arith.constant 0 : index
    %c0_25 = arith.constant 0 : index
    %49 = vector.load %arg3[%c7, %c0_24, %c0_25] : memref<9x4x100xbf16, #tpu.memory_space<vmem>>, vector<1x4x100xbf16>
    %50 = vector.shape_cast %49 : vector<1x4x100xbf16> to vector<4x100xbf16>
    %cst_26 = arith.constant dense<0.000000e+00> : vector<256x100xf32>
    %51 = tpu.matmul %48, %50, %cst_26 {dimension_numbers = #tpu.dot_dimension_numbers<[1], [0], [0], [1], [0, 0, 1, 1], [], []>} : vector<256x4xbf16>, vector<4x100xbf16>, vector<256x100xf32> -> vector<256x100xf32>
    %52 = arith.addf %46, %51 : vector<256x100xf32>
    %53 = vector.extract_strided_slice %3 {offsets = [2, 2, 0], sizes = [16, 16, 4], strides = [1, 1, 1]} : vector<18x18x4xbf16> to vector<16x16x4xbf16>
    %54 = vector.shape_cast %53 : vector<16x16x4xbf16> to vector<256x4xbf16>
    %c8 = arith.constant 8 : index
    %c0_27 = arith.constant 0 : index
    %c0_28 = arith.constant 0 : index
    %55 = vector.load %arg3[%c8, %c0_27, %c0_28] : memref<9x4x100xbf16, #tpu.memory_space<vmem>>, vector<1x4x100xbf16>
    %56 = vector.shape_cast %55 : vector<1x4x100xbf16> to vector<4x100xbf16>
    %cst_29 = arith.constant dense<0.000000e+00> : vector<256x100xf32>
    %57 = tpu.matmul %54, %56, %cst_29 {dimension_numbers = #tpu.dot_dimension_numbers<[1], [0], [0], [1], [0, 0, 1, 1], [], []>} : vector<256x4xbf16>, vector<4x100xbf16>, vector<256x100xf32> -> vector<256x100xf32>
    %58 = arith.addf %52, %57 : vector<256x100xf32>
    %c0_30 = arith.constant 0 : index
    %c0_31 = arith.constant 0 : index
    %59 = vector.load %arg4[%c0_30, %c0_31] : memref<1x100xf32, #tpu.memory_space<vmem>>, vector<1x100xf32>
    %60 = vector.broadcast %59 : vector<1x100xf32> to vector<256x100xf32>
    %61 = arith.addf %58, %60 : vector<256x100xf32>
    %cst_32 = arith.constant 0.000000e+00 : f32
    %62 = vector.broadcast %cst_32 : f32 to vector<256x100xf32>
    %63 = arith.maximumf %61, %62 : vector<256x100xf32>
    %64 = arith.truncf %63 : vector<256x100xf32> to vector<256x100xbf16>
    %c0_33 = arith.constant 0 : index
    %c0_34 = arith.constant 0 : index
    %65 = vector.load %arg5[%c0_33, %c0_34] : memref<100x50xbf16, #tpu.memory_space<vmem>>, vector<100x50xbf16>
    %cst_35 = arith.constant dense<0.000000e+00> : vector<256x50xf32>
    %66 = tpu.matmul %64, %65, %cst_35 {dimension_numbers = #tpu.dot_dimension_numbers<[1], [0], [0], [1], [0, 0, 1, 1], [], []>} : vector<256x100xbf16>, vector<100x50xbf16>, vector<256x50xf32> -> vector<256x50xf32>
    %c0_36 = arith.constant 0 : index
    %c0_37 = arith.constant 0 : index
    %67 = vector.load %arg6[%c0_36, %c0_37] : memref<1x50xf32, #tpu.memory_space<vmem>>, vector<1x50xf32>
    %68 = vector.broadcast %67 : vector<1x50xf32> to vector<256x50xf32>
    %69 = arith.addf %66, %68 : vector<256x50xf32>
    %cst_38 = arith.constant 0.000000e+00 : f32
    %70 = vector.broadcast %cst_38 : f32 to vector<256x50xf32>
    %71 = arith.maximumf %69, %70 : vector<256x50xf32>
    %72 = arith.truncf %71 : vector<256x50xf32> to vector<256x50xbf16>
    %c0_39 = arith.constant 0 : index
    %c0_40 = arith.constant 0 : index
    %73 = vector.load %arg7[%c0_39, %c0_40] : memref<10x50xbf16, #tpu.memory_space<vmem>>, vector<10x50xbf16>
    %cst_41 = arith.constant dense<0.000000e+00> : vector<10x256xf32>
    %74 = tpu.matmul %73, %72, %cst_41 {dimension_numbers = #tpu.dot_dimension_numbers<[1], [1], [0], [0], [0, 0, 1, 0], [], []>} : vector<10x50xbf16>, vector<256x50xbf16>, vector<10x256xf32> -> vector<10x256xf32>
    %c0_42 = arith.constant 0 : index
    %c0_43 = arith.constant 0 : index
    %75 = vector.load %arg8[%c0_42, %c0_43] : memref<10x1xf32, #tpu.memory_space<vmem>>, vector<10x1xf32>
    %76 = vector.broadcast %75 : vector<10x1xf32> to vector<10x256xf32>
    %77 = arith.addf %74, %76 : vector<10x256xf32>
    %c0_44 = arith.constant 0 : index
    %c0_45 = arith.constant 0 : index
    %c0_46 = arith.constant 0 : index
    %78 = vector.load %arg9[%c0_44, %c0_45, %c0_46] : memref<1x10x256xf32, #tpu.memory_space<vmem>>, vector<1x10x256xf32>
    %79 = vector.shape_cast %78 : vector<1x10x256xf32> to vector<10x256xf32>
    %80 = vector.shape_cast %77 : vector<10x256xf32> to vector<1x10x256xf32>
    tpu.vector_store %arg9[%c0_44, %c0_45, %c0_46], %80 {strides = array<i32>} : memref<1x10x256xf32, #tpu.memory_space<vmem>>, vector<1x10x256xf32>,
    return
  }
  func.func @transform_0(%arg0: i32, %arg1: i32) -> (i32, i32, i32, i32) {
    %c0_i32 = arith.constant 0 : i32
    %c0_i32_0 = arith.constant 0 : i32
    %c0_i32_1 = arith.constant 0 : i32
    %c0_i32_2 = arith.constant 0 : i32
    return %arg0, %c0_i32, %c0_i32_0, %c0_i32_1 : i32, i32, i32, i32
  }
  func.func @transform_1(%arg0: i32, %arg1: i32) -> (i32, i32, i32) {
    %c0_i32 = arith.constant 0 : i32
    %c0_i32_0 = arith.constant 0 : i32
    %c0_i32_1 = arith.constant 0 : i32
    %c0_i32_2 = arith.constant 0 : i32
    return %c0_i32, %c0_i32_0, %c0_i32_1 : i32, i32, i32
  }
  func.func @transform_2(%arg0: i32, %arg1: i32) -> (i32, i32) {
    %c0_i32 = arith.constant 0 : i32
    %c0_i32_0 = arith.constant 0 : i32
    %c0_i32_1 = arith.constant 0 : i32
    return %c0_i32, %c0_i32_0 : i32, i32
  }
  func.func @transform_3(%arg0: i32, %arg1: i32) -> (i32, i32) {
    %c0_i32 = arith.constant 0 : i32
    %c0_i32_0 = arith.constant 0 : i32
    %c0_i32_1 = arith.constant 0 : i32
    return %c0_i32, %c0_i32_0 : i32, i32
  }
  func.func @transform_4(%arg0: i32, %arg1: i32) -> (i32, i32) {
    %c0_i32 = arith.constant 0 : i32
    %c0_i32_0 = arith.constant 0 : i32
    %c0_i32_1 = arith.constant 0 : i32
    return %c0_i32, %c0_i32_0 : i32, i32
  }
  func.func @transform_5(%arg0: i32, %arg1: i32) -> (i32, i32) {
    %c0_i32 = arith.constant 0 : i32
    %c0_i32_0 = arith.constant 0 : i32
    %c0_i32_1 = arith.constant 0 : i32
    return %c0_i32, %c0_i32_0 : i32, i32
  }
  func.func @transform_6(%arg0: i32, %arg1: i32) -> (i32, i32) {
    %c0_i32 = arith.constant 0 : i32
    %c0_i32_0 = arith.constant 0 : i32
    %c0_i32_1 = arith.constant 0 : i32
    return %c0_i32, %c0_i32_0 : i32, i32
  }
  func.func @transform_7(%arg0: i32, %arg1: i32) -> (i32, i32, i32) {
    %c0_i32 = arith.constant 0 : i32
    %c0_i32_0 = arith.constant 0 : i32
    return %arg0, %c0_i32, %arg1 : i32, i32, i32
  }
}

</mosaic_0001>

<bundles_post_ra>
// kernel: parm_forward.1
= control target key start
LH: loop header
LB: loop body
LE: loop exit
PB: predicated region body
PF: predicated region fallthrough
CT: control target
= control target key end

     0   :  { %s4833_s24 = smov 0   ;;  %s4835_s25 = smov 0   ;;  %s6054_s0 = inlined_call_operand.vmem [shape: bf16[2,18,18,4], index: 0, kind: input, shape index: {}]   ;;  %s6055_s1 = inlined_call_operand.vmem [shape: bf16[9,4,100], index: 1, kind: input, shape index: {}]   ;;  %s6056_s2 = inlined_call_operand.vmem [shape: f32[1,100], index: 2, kind: input, shape index: {}]   ;;  %s6057_s3 = inlined_call_operand.vmem [shape: bf16[100,50], index: 3, kind: input, shape index: {}]   ;;  %s6058_s4 = inlined_call_operand.vmem [shape: f32[1,50], index: 4, kind: input, shape index: {}]   ;;  %s6059_s5 = inlined_call_operand.vmem [shape: bf16[10,50], index: 5, kind: input, shape index: {}]   ;;  %s6060_s6 = inlined_call_operand.vmem [shape: f32[10,1], index: 6, kind: input, shape index: {}]   ;;  %s6061_s7 = inlined_call_operand.vmem [shape: f32[2,10,256], index: 7, kind: output, shape index: {}]  }
   0x1   :  { %s4837_s26 = smov 0  }
   0x2 LB: > { %s29_s27 = sadd.s32 1, %s4786_s25  ;;  %p3634_p0 = scmp.ge.s32.totalorder %s4790_s26, 1  ;;  %s4790_s26 = sphi %s4837_s26, %s17_s26   ;;  %s4786_s25 = sphi %s4835_s25, %s6152_s25   ;;  %s4782_s24 = sphi %s4833_s24, %s6151_s24  }
   0x3   : > { %p31_p1 = scmp.ge.s32.totalorder %s29_s27, 2  ;;  %p251_p2 = scmp.lt.s32.totalorder %s4790_s26, 3 }
   0x5   : > { %s6154_s27 = smov (%p31_p1, %s29_s27), 0  ;;  %p252_p3 = pnand %p3634_p0, %p251_p2 }
   0x7   : > { %255 = sbr.rel (%p252_p3) target bundleno = 1061 (0x425), region = 48 }
   0xe   : > { %v3638_v0 = vld [vmem:[%s6055_s1 + $0x2] sm:$0x3]  ;;  %vm848_vm0 = vcmask 1041408   ;;  %v3770_v1 = vld [vmem:[%s6055_s1 + $0x8] sm:$0x3]  ;;  %p287_p4 = scmp.lt.s32.totalorder %s4782_s24, 1 }
   0xf   : > { %4694 = vmatprep.subr.msk.bf16.mxu1 %vm848_vm0, %v3638_v0  ;;  %4698 = vmatprep.subr.msk.bf16.mxu0 %vm848_vm0, %v3770_v1  ;;  %v850_v2 = vsel %vm848_vm0, %v3638_v0, 0  ;;  %v1969_v3 = vsel %vm848_vm0, %v3770_v1, 0  ;;  %v3789_v4 = vld [vmem:[%s6055_s1 + $0xa] sm:$0x3]  ;;  %v361_v5 = vld [vmem:[%s6055_s1] sm:$0x3] }
  0x10   : > { %4087 = vmatpush3.bf16.msra.mxu1 %v850_v2  ;;  %4223 = vmatpush3.bf16.msra.mxu0 %v1969_v3  ;;  %s6156_s24 = smov (!%p287_p4, %s4782_s24), 1  ;;  %vm362_vm1 = vsmask.f32 3328  ;;  %vm363_vm2 = vsmask.f32 7440  ;;  %v4871_v6 = vsel %vm848_vm0, %v3789_v4, 0 }
  0x11   : > { %4699 = vmatprep.subr.msk.bf16.mxu0 %vm848_vm0, %v3789_v4  ;;  %4695 = vmatprep.subr.msk.bf16.mxu1 %vm848_vm0, %v361_v5  ;;  %s4712_s13 = smul.u32 216, %s6156_s24  ;;  %v4876_v7 = vsel %vm848_vm0, %v361_v5, 0  ;;  %v4881_v8 = vld [vmem:[%s6055_s1 + $0xc] sm:$0x3]  ;;  %vm799_vm3 = vcmask 31744   ;;  %vm4924_vm4 = vmor %vm362_vm1, %vm363_vm2  ;;  %vm1321_vm5 = vcmask 1042432  }
  0x12   : > { %v4912_v21 = vsel %vm848_vm0, %v4881_v8, 0  ;;  %vm1322_vm6 = vcmask 1046532   ;;  %v4757_v35 = vld [vmem:[%s6057_s3] sm:$0xff]   ;;  %vm3168_vm8 = vcmask 818176   ;;  %vm3448_vm9 = vcmask 408576  }
  0x13   : > { %s4886_s18 = scalar_lea.vmem %s6054_s0, %s4712_s13  ;;  %vm5292_vm7 = vmor %vm1321_vm5, %vm1322_vm6  ;;  %s3891_s13 = sshll.u32 %s6156_s24, 5 }
  0x14   : > { %v4889_v9 = vld [vmem:[%s4886_s18] sm:$0xf]  ;;  %v4892_v10 = vld [vmem:[%s4886_s18 + $0x4] sm:$0xf]  ;;  %v309_v11 = vld [vmem:[%s4886_s18 + $0x8] sm:$0x1]  ;;  %s300_s16 = scalar_lea.vmem %s6061_s7, %s3891_s13 }
  0x15   : > { %v366_v12 = vshrl.u32 %v4889_v9, 16  ;;  %v369_v13 = vshll.u32 %v4889_v9, 16  ;;  %v375_v14 = vshll.u32 %v4892_v10, 16  ;;  %v379_v15 = vshrl.u32 %v4892_v10, 16  ;;  %v4900_v16 = vld [vmem:[%s4886_s18 + $0xc] sm:$0xf] }
  0x16   : > { %v385_v17 = vshll.u32 %v309_v11, 16  ;;  %v4903_v18 = vld [vmem:[%s4886_s18 + $0x10] sm:$0xf]  ;;  %v4906_v19 = vld [vmem:[%s4886_s18 + $0x14] sm:$0x1]  ;;  %v390_v27 = vshrl.u32 %v4900_v16, 16 }
  0x17   : > { %v368_v22 = vrot.slane %v366_v12, 4  ;;  %v371_v23 = vrot.slane %v369_v13, 5  ;;  %v377_v24 = vrot.slane %v375_v14, 5  ;;  %v381_v25 = vrot.slane %v379_v15, 4  ;;  %v4920_v34 = vld [vmem:[%s4886_s18 + $0x18] sm:$0xf] }
  0x18   : > { %v387_v26 = vrot.slane %v385_v17, 5  ;;  %v393_v28 = vshll.u32 %v4900_v16, 16  ;;  %v399_v29 = vshll.u32 %v4903_v18, 16  ;;  %v403_v32 = vshrl.u32 %v4903_v18, 16  ;;  %v4933_v40 = vld [vmem:[%s4886_s18 + $0x1c] sm:$0xf] }
  0x19   : > { %v372_v30 = vor.u32 %v371_v23, %v368_v22  ;;  %v382_v31 = vor.u32 %v381_v25, %v377_v24  ;;  %v409_v33 = vshll.u32 %v4906_v19, 16  ;;  %v392_v36 = vrot.slane %v390_v27, 4  ;;  %v4937_v47 = vld [vmem:[%s4886_s18 + $0x20] sm:$0x1]  ;;  %v4947_v58 = vld [vmem:[%s4886_s18 + $0x24] sm:$0xf] }
  0x1a   : > { %v395_v37 = vrot.slane %v393_v28, 5  ;;  %v401_v38 = vrot.slane %v399_v29, 5  ;;  %v4930_v39 = vcombine.low %v4900_v16, %v4903_v18  ;;  %v405_v43 = vrot.slane %v403_v32, 4  ;;  %v4952_v63 = vld [vmem:[%s4886_s18 + $0x28] sm:$0xf] }
  0x1b   : > { %v373_v41 = vrot.slane %v372_v30, 4  ;;  %v383_v42 = vrot.slane %v382_v31, 4  ;;  %v411_v44 = vrot.slane %v409_v33, 5  ;;  %v414_v48 = vshrl.u32 %v4920_v34, 16  ;;  %v4960_v4 = vld [vmem:[%s4886_s18 + $0x2c] sm:$0x1] }
  0x1c   : > { %v396_v45 = vor.u32 %v395_v37, %v392_v36  ;;  %v417_v49 = vshll.u32 %v4920_v34, 16  ;;  %v406_v52 = vor.u32 %v405_v43, %v401_v38  ;;  %v423_v53 = vshll.u32 %v4933_v40, 16  ;;  %v4966_v14 = vld [vmem:[%s4886_s18 + $0x30] sm:$0xf]  ;;  %v4973_v28 = vld [vmem:[%s4886_s18 + $0x34] sm:$0xf] }
  0x1d   : > { %v378_v50 = vsel %vm4924_vm4, %v373_v41, %v377_v24  ;;  %v388_v51 = vsel %vm4924_vm4, %v383_v42, %v387_v26  ;;  %v416_v56 = vrot.slane %v414_v48, 4  ;;  %v427_v61 = vshrl.u32 %v4933_v40, 16  ;;  %v4980_v32 = vld [vmem:[%s4886_s18 + $0x38] sm:$0x1]  ;;  %v4988_v48 = vld [vmem:[%s4886_s18 + $0x3c] sm:$0xf] }
  0x1e   : > { %v3639_v54 = vcombine.low %v378_v50, %v388_v51  ;;  %v397_v55 = vrot.slane %v396_v45, 4  ;;  %v419_v57 = vrot.slane %v417_v49, 5  ;;  %v407_v59 = vrot.slane %v406_v52, 4 }
  0x1f   : > { %v425_v60 = vrot.slane %v423_v53, 5  ;;  %v433_v62 = vshll.u32 %v4937_v47, 16  ;;  %v429_v11 = vrot.slane %v427_v61, 4  ;;  %v438_v13 = vshrl.u32 %v4947_v58, 16  ;;  %v4994_v53 = vld [vmem:[%s4886_s18 + $0x40] sm:$0xf] }
  0x20   : > { %4088 = vmatprep.mubr.msk.bf16.mxu1 %vm799_vm3, %v3639_v54  ;;  %v402_v0 = vsel %vm4924_vm4, %v397_v55, %v401_v38  ;;  %v420_v1 = vor.u32 %v419_v57, %v416_v56  ;;  %v412_v5 = vsel %vm4924_vm4, %v407_v59, %v411_v44  ;;  %v441_v22 = vshll.u32 %v4947_v58, 16 }
  0x21   : > { %v435_v12 = vrot.slane %v433_v62, 5  ;;  %v3640_v15 = vcombine.low %v402_v0, %v412_v5  ;;  %v447_v23 = vshll.u32 %v4952_v63, 16  ;;  %v430_v24 = vor.u32 %v429_v11, %v425_v60 }
  0x22   : > { %v421_v17 = vrot.slane %v420_v1, 4  ;;  %v440_v25 = vrot.slane %v438_v13, 4  ;;  %v451_v26 = vshrl.u32 %v4952_v63, 16  ;;  %v457_v27 = vshll.u32 %v4960_v4, 16  ;;  %v5006_v1 = vld [vmem:[%s4886_s18 + $0x44] sm:$0x1] }
  0x23   : > { %4224 = vmatprep.mubr.msk.bf16.mxu0 %vm799_vm3, %v3640_v15  ;;  %4089 = vmatmul.mubr.msk.bf16.vlgmr.msra.gmra.mrb[0].mxu1 %vm799_vm3, %v3640_v15  ;;  %v443_v30 = vrot.slane %v441_v22, 5  ;;  %v449_v31 = vrot.slane %v447_v23, 5  ;;  %v462_v33 = vshrl.u32 %v4966_v14, 16  ;;  %v431_v36 = vrot.slane %v430_v24, 4  ;;  %v5018_v23 = vld [vmem:[%s4886_s18 + $0x4c] sm:$0xf] }
  0x24   : > { %v426_v29 = vsel %vm4924_vm4, %v421_v17, %v425_v60  ;;  %v453_v37 = vrot.slane %v451_v26, 4  ;;  %v459_v38 = vrot.slane %v457_v27, 5  ;;  %v465_v41 = vshll.u32 %v4966_v14, 16  ;;  %4121 = vmatpush3.bf16.msra.mxu1 %v4876_v7 }
  0x25   : > { %v444_v42 = vor.u32 %v443_v30, %v440_v25  ;;  %v464_v43 = vrot.slane %v462_v33, 4  ;;  %v471_v44 = vshll.u32 %v4973_v28, 16  ;;  %v475_v45 = vshrl.u32 %v4973_v28, 16 }
  0x26   : > { %v436_v49 = vsel %vm4924_vm4, %v431_v36, %v435_v12  ;;  %v454_v50 = vor.u32 %v453_v37, %v449_v31  ;;  %v467_v51 = vrot.slane %v465_v41, 5  ;;  %v481_v52 = vshll.u32 %v4980_v32, 16  ;;  %v5011_v12 = vld [vmem:[%s4886_s18 + $0x48] sm:$0xf]  ;;  %v5040_v41 = vld [vmem:[%s4886_s18 + $0x54] sm:$0xf] }
  0x27   : > { %v4996_v7 = vcombine.low %v426_v29, %v436_v49  ;;  %v445_v54 = vrot.slane %v444_v42, 4  ;;  %v473_v55 = vrot.slane %v471_v44, 5  ;;  %v477_v56 = vrot.slane %v475_v45, 4  ;;  %v5045_v49 = vld [vmem:[%s4886_s18 + $0x58] sm:$0xf] }
  0x28   : > { %v455_v57 = vrot.slane %v454_v50, 4  ;;  %v468_v59 = vor.u32 %v467_v51, %v464_v43  ;;  %v483_v60 = vrot.slane %v481_v52, 5  ;;  %v486_v61 = vshrl.u32 %v4988_v48, 16 }
  0x29   : > { %6096 = vst [vmem:[#allocation2_spill] sm:$0xff] %v4996_v7  ;;  %4225 = vmatmul.mubr.msk.bf16.vlgmr.msra.gmra.mrb[0].mxu0 %vm799_vm3, %v4996_v7  ;;  %4092 = vmatprep.mubr.msk.bf16.mxu1 %vm799_vm3, %v4996_v7  ;;  %v450_v62 = vsel %vm4924_vm4, %v445_v54, %v449_v31  ;;  %v478_v0 = vor.u32 %v477_v56, %v473_v55  ;;  %v489_v5 = vshll.u32 %v4988_v48, 16  ;;  %v495_v11 = vshll.u32 %v4994_v53, 16 }
  0x2a   : > { %4257 = vmatpush3.bf16.msra.mxu0 %v4871_v6  ;;  %v460_v13 = vsel %vm4924_vm4, %v455_v57, %v459_v38  ;;  %v469_v15 = vrot.slane %v468_v59, 4  ;;  %v488_v17 = vrot.slane %v486_v61, 4  ;;  %v499_v22 = vshrl.u32 %v4994_v53, 16 }
  0x2b   : > { %v5020_v24 = vcombine.low %v450_v62, %v460_v13  ;;  %v479_v25 = vrot.slane %v478_v0, 4  ;;  %v491_v26 = vrot.slane %v489_v5, 5  ;;  %v497_v27 = vrot.slane %v495_v11, 5  ;;  %4700 = vmatprep.subr.msk.bf16.mxu0 %vm848_vm0, %v4881_v8  ;;  %v5035_v8 = vld [vmem:[%s4886_s18 + $0x50] sm:$0x1] }
  0x2c   : > { %v474_v6 = vsel %vm4924_vm4, %v469_v15, %v473_v55  ;;  %v501_v29 = vrot.slane %v499_v22, 4  ;;  %v505_v30 = vshll.u32 %v5006_v1, 16  ;;  %v510_v31 = vshrl.u32 %v5011_v12, 16  ;;  %v5058_v0 = vld [vmem:[%s4886_s18 + $0x5c] sm:$0x1] }
  0x2d   : > { %6097 = vst [vmem:[#allocation3_spill] sm:$0xff] %v5020_v24  ;;  %4228 = vmatprep.mubr.msk.bf16.mxu0 %vm799_vm3, %v5020_v24  ;;  %4093 = vmatmul.mubr.msk.bf16.gmra.mrb[4].mxu1 %vm799_vm3, %v5020_v24  ;;  %v484_v33 = vsel %vm4924_vm4, %v479_v25, %v483_v60  ;;  %v492_v36 = vor.u32 %v491_v26, %v488_v17  ;;  %v513_v37 = vshll.u32 %v5011_v12, 16  ;;  %v519_v38 = vshll.u32 %v5018_v23, 16  ;;  %v5062_v11 = vld [vmem:[%s4886_s18 + $0x60] sm:$0xf] }
  0x2e   : > { %v5042_v42 = vcombine.low %v474_v6, %v484_v33  ;;  %v502_v43 = vor.u32 %v501_v29, %v497_v27  ;;  %v507_v44 = vrot.slane %v505_v30, 5  ;;  %v512_v45 = vrot.slane %v510_v31, 4  ;;  %v5067_v25 = vld [vmem:[%s4886_s18 + $0x64] sm:$0xf] }
  0x2f   : > { %v493_v50 = vrot.slane %v492_v36, 4  ;;  %v515_v51 = vrot.slane %v513_v37, 5  ;;  %v521_v52 = vrot.slane %v519_v38, 5  ;;  %v523_v54 = vshrl.u32 %v5018_v23, 16 }
  0x30   : > { %6098 = vst [vmem:[#allocation4_spill] sm:$0xff] %v5042_v42  ;;  %4096 = vmatprep.mubr.msk.bf16.mxu1 %vm799_vm3, %v5042_v42  ;;  %v503_v55 = vrot.slane %v502_v43, 4  ;;  %v529_v56 = vshll.u32 %v5035_v8, 16  ;;  %v534_v57 = vshrl.u32 %v5040_v41, 16  ;;  %v537_v59 = vshll.u32 %v5040_v41, 16 }
  0x31   : > { %4229 = vmatmul.mubr.msk.bf16.gmra.mrb[4].mxu0 %vm799_vm3, %v5042_v42  ;;  %v498_v60 = vsel %vm4924_vm4, %v493_v50, %v497_v27  ;;  %v516_v61 = vor.u32 %v515_v51, %v512_v45  ;;  %v525_v62 = vrot.slane %v523_v54, 4  ;;  %v543_v5 = vshll.u32 %v5045_v49, 16  ;;  %v5081_v43 = vld [vmem:[%s4886_s18 + $0x68] sm:$0x1] }
  0x32   : > { %v508_v13 = vsel %vm4924_vm4, %v503_v55, %v507_v44  ;;  %v531_v15 = vrot.slane %v529_v56, 5  ;;  %v536_v17 = vrot.slane %v534_v57, 4  ;;  %v539_v22 = vrot.slane %v537_v59, 5  ;;  %v5086_v56 = vld [vmem:[%s4886_s18 + $0x6c] sm:$0xf] }
  0x33   : > { %v5069_v26 = vcombine.low %v498_v60, %v508_v13  ;;  %v517_v27 = vrot.slane %v516_v61, 4  ;;  %v526_v6 = vor.u32 %v525_v62, %v521_v52  ;;  %v545_v29 = vrot.slane %v543_v5, 5  ;;  %v5092_v61 = vld [vmem:[%s4886_s18 + $0x70] sm:$0xf] }
  0x34   : > { %v540_v30 = vor.u32 %v539_v22, %v536_v17  ;;  %v547_v31 = vshrl.u32 %v5045_v49, 16  ;;  %v553_v33 = vshll.u32 %v5058_v0, 16  ;;  %v558_v36 = vshrl.u32 %v5062_v11, 16  ;;  %v5100_v22 = vld [vmem:[%s4886_s18 + $0x74] sm:$0x1] }
  0x35   : > { %6099 = vst [vmem:[#allocation5_spill] sm:$0xff] %v5069_v26  ;;  %4232 = vmatprep.mubr.msk.bf16.mxu0 %vm799_vm3, %v5069_v26  ;;  %4097 = vmatmul.mubr.msk.bf16.gmra.mrb[8].mxu1 %vm799_vm3, %v5069_v26  ;;  %v522_v37 = vsel %vm4924_vm4, %v517_v27, %v521_v52  ;;  %v527_v38 = vrot.slane %v526_v6, 4  ;;  %v561_v44 = vshll.u32 %v5062_v11, 16  ;;  %v567_v45 = vshll.u32 %v5067_v25, 16 }
  0x36   : > { %v541_v50 = vrot.slane %v540_v30, 4  ;;  %v549_v51 = vrot.slane %v547_v31, 4  ;;  %v555_v54 = vrot.slane %v553_v33, 5  ;;  %v560_v55 = vrot.slane %v558_v36, 4  ;;  %v5105_v31 = vld [vmem:[%s4886_s18 + $0x78] sm:$0xf] }
  0x37   : > { %v532_v57 = vsel %vm4924_vm4, %v527_v38, %v531_v15  ;;  %v563_v59 = vrot.slane %v561_v44, 5  ;;  %v569_v52 = vrot.slane %v567_v45, 5  ;;  %v571_v60 = vshrl.u32 %v5067_v25, 16  ;;  %v5110_v33 = vld [vmem:[%s6055_s1 + $0x4] sm:$0x3] }
  0x38   : > { %v5094_v62 = vcombine.low %v522_v37, %v532_v57  ;;  %v546_v5 = vsel %vm4924_vm4, %v541_v50, %v545_v29  ;;  %v550_v13 = vor.u32 %v549_v51, %v545_v29  ;;  %v577_v17 = vshll.u32 %v5081_v43, 16  ;;  %6101 = vst [vmem:[#allocation7_spill] sm:$0xff] %v5110_v33  ;;  %v5119_v44 = vld [vmem:[%s4886_s18 + $0x7c] sm:$0xf]  ;;  %4696 = vmatprep.subr.msk.bf16.mxu1 %vm848_vm0, %v5110_v33  ;;  %v5213_v33 = vld [vmem:[%s4886_s18 + $0xa8] sm:$0xf] }
  0x39   : > { %v564_v27 = vor.u32 %v563_v59, %v560_v55  ;;  %v573_v6 = vrot.slane %v571_v60, 4  ;;  %v582_v15 = vshrl.u32 %v5086_v56, 16  ;;  %v585_v30 = vshll.u32 %v5086_v56, 16  ;;  %6111 = vst [vmem:[#allocation17_spill] sm:$0xff] %v5213_v33 }
  0x3a   : > { %6100 = vst [vmem:[#allocation6_spill] sm:$0xff] %v5094_v62  ;;  %4233 = vmatmul.mubr.msk.bf16.gmra.mrb[8].mxu0 %vm799_vm3, %v5094_v62  ;;  %4100 = vmatprep.mubr.msk.bf16.mxu1 %vm799_vm3, %v5094_v62  ;;  %v551_v29 = vrot.slane %v550_v13, 4  ;;  %v579_v36 = vrot.slane %v577_v17, 5  ;;  %v591_v37 = vshll.u32 %v5092_v61, 16  ;;  %v595_v38 = vshrl.u32 %v5092_v61, 16 }
  0x3b   : > { %v565_v45 = vrot.slane %v564_v27, 4  ;;  %v574_v50 = vor.u32 %v573_v6, %v569_v52  ;;  %v584_v51 = vrot.slane %v582_v15, 4  ;;  %v587_v55 = vrot.slane %v585_v30, 5  ;;  %v5127_v17 = vld [vmem:[%s4886_s18 + $0x80] sm:$0x1] }
  0x3c   : > { %v556_v57 = vsel %vm4924_vm4, %v551_v29, %v555_v54  ;;  %v593_v59 = vrot.slane %v591_v37, 5  ;;  %v597_v60 = vrot.slane %v595_v38, 4  ;;  %v601_v13 = vshll.u32 %v5100_v22, 16  ;;  %v5134_v30 = vld [vmem:[%s4886_s18 + $0x84] sm:$0xf] }
  0x3d   : > { %v5129_v3 = vcombine.low %v546_v5, %v556_v57  ;;  %v570_v27 = vsel %vm4924_vm4, %v565_v45, %v569_v52  ;;  %v575_v6 = vrot.slane %v574_v50, 4  ;;  %v588_v15 = vor.u32 %v587_v55, %v584_v51  ;;  %v5139_v29 = vld [vmem:[%s4886_s18 + $0x88] sm:$0xf]  ;;  %v5186_v62 = vld [vmem:[%s4886_s18 + $0x9c] sm:$0xf] }
  0x3e   : > { %v598_v20 = vor.u32 %v597_v60, %v593_v59  ;;  %v603_v46 = vrot.slane %v601_v13, 5  ;;  %v606_v2 = vshrl.u32 %v5105_v31, 16  ;;  %v609_v54 = vshll.u32 %v5105_v31, 16  ;;  %6108 = vst [vmem:[#allocation14_spill] sm:$0xff] %v5186_v62 }
  0x3f   : > { %6102 = vst [vmem:[#allocation8_spill] sm:$0xff] %v5129_v3  ;;  %4236 = vmatprep.mubr.msk.bf16.mxu0 %vm799_vm3, %v5129_v3  ;;  %4101 = vmatmul.mubr.msk.bf16.gmra.mrb[12].mxu1 %vm799_vm3, %v5129_v3  ;;  %v580_v52 = vsel %vm4924_vm4, %v575_v6, %v579_v36  ;;  %v589_v5 = vrot.slane %v588_v15, 4  ;;  %v615_v37 = vshll.u32 %v5119_v44, 16  ;;  %v619_v38 = vshrl.u32 %v5119_v44, 16  ;;  %v5166_v6 = vld [vmem:[%s4886_s18 + $0x90] sm:$0xf] }
  0x40   : > { %v5149_v45 = vcombine.low %v570_v27, %v580_v52  ;;  %v599_v50 = vrot.slane %v598_v20, 4  ;;  %v608_v51 = vrot.slane %v606_v2, 4  ;;  %v611_v55 = vrot.slane %v609_v54, 5  ;;  %v5161_v2 = vld [vmem:[%s4886_s18 + $0x8c] sm:$0x1]  ;;  %6104 = vst [vmem:[#allocation10_spill] sm:$0xff] %v5166_v6 }
  0x41   : > { %v594_v57 = vsel %vm4924_vm4, %v589_v5, %v593_v59  ;;  %v617_v60 = vrot.slane %v615_v37, 5  ;;  %v621_v13 = vrot.slane %v619_v38, 4  ;;  %v625_v3 = vshll.u32 %v5127_v17, 16 }
  0x42   : > { %6103 = vst [vmem:[#allocation9_spill] sm:$0xff] %v5149_v45  ;;  %4237 = vmatmul.mubr.msk.bf16.gmra.mrb[12].mxu0 %vm799_vm3, %v5149_v45  ;;  %4104 = vmatprep.mubr.msk.bf16.mxu1 %vm799_vm3, %v5149_v45  ;;  %v604_v36 = vsel %vm4924_vm4, %v599_v50, %v603_v46  ;;  %v612_v20 = vor.u32 %v611_v55, %v608_v51  ;;  %v630_v27 = vshrl.u32 %v5134_v30, 16  ;;  %v633_v59 = vshll.u32 %v5134_v30, 16  ;;  %v5173_v51 = vld [vmem:[%s4886_s18 + $0x94] sm:$0xf] }
  0x43   : > { %v5168_v15 = vcombine.low %v594_v57, %v604_v36  ;;  %v622_v54 = vor.u32 %v621_v13, %v617_v60  ;;  %v627_v52 = vrot.slane %v625_v3, 5  ;;  %v639_v5 = vshll.u32 %v5139_v29, 16  ;;  %6106 = vst [vmem:[#allocation12_spill] sm:$0xff] %v5173_v51 }
  0x44   : > { %v613_v37 = vrot.slane %v612_v20, 4  ;;  %v632_v38 = vrot.slane %v630_v27, 4  ;;  %v635_v46 = vrot.slane %v633_v59, 5  ;;  %v643_v50 = vshrl.u32 %v5139_v29, 16  ;;  %v5182_v27 = vld [vmem:[%s4886_s18 + $0x98] sm:$0x1] }
  0x45   : > { %6105 = vst [vmem:[#allocation11_spill] sm:$0xff] %v5168_v15  ;;  %4240 = vmatprep.mubr.msk.bf16.mxu0 %vm799_vm3, %v5168_v15  ;;  %v623_v55 = vrot.slane %v622_v54, 4  ;;  %v641_v45 = vrot.slane %v639_v5, 5  ;;  %v649_v57 = vshll.u32 %v5161_v2, 16  ;;  %v654_v13 = vshrl.u32 %v5166_v6, 16  ;;  %6107 = vst [vmem:[#allocation13_spill] sm:$0xff] %v5182_v27 }
  0x46   : > { %v618_v3 = vsel %vm4924_vm4, %v613_v37, %v617_v60  ;;  %v636_v36 = vor.u32 %v635_v46, %v632_v38  ;;  %v645_v20 = vrot.slane %v643_v50, 4  ;;  %v657_v59 = vshll.u32 %v5166_v6, 16  ;;  %v5196_v50 = vld [vmem:[%s4886_s18 + $0xa0] sm:$0xf]  ;;  %v5227_v6 = vld [vmem:[%s4886_s18 + $0xb0] sm:$0x1] }
  0x47   : > { %4105 = vmatmul.mubr.msk.bf16.gmra.mrb[16].mxu1 %vm799_vm3, %v5168_v15  ;;  %v628_v54 = vsel %vm4924_vm4, %v623_v55, %v627_v52  ;;  %v651_v5 = vrot.slane %v649_v57, 5  ;;  %v656_v26 = vrot.slane %v654_v13, 4  ;;  %v663_v42 = vshll.u32 %v5173_v51, 16 }
  0x48   : > { %v5193_v60 = vcombine.low %v618_v3, %v628_v54  ;;  %v637_v37 = vrot.slane %v636_v36, 4  ;;  %v646_v38 = vor.u32 %v645_v20, %v641_v45  ;;  %v659_v46 = vrot.slane %v657_v59, 5  ;;  %v5208_v3 = vld [vmem:[%s4886_s18 + $0xa4] sm:$0x1] }
  0x49   : > { %v665_v24 = vrot.slane %v663_v42, 5  ;;  %v667_v7 = vshrl.u32 %v5173_v51, 16  ;;  %v673_v15 = vshll.u32 %v5182_v27, 16  ;;  %v678_v52 = vshrl.u32 %v5186_v62, 16  ;;  %6110 = vst [vmem:[#allocation16_spill] sm:$0xff] %v5208_v3 }
  0x4a   : > { %6109 = vst [vmem:[#allocation15_spill] sm:$0xff] %v5193_v60  ;;  %4241 = vmatmul.mubr.msk.bf16.gmra.mrb[16].mxu0 %vm799_vm3, %v5193_v60  ;;  %4108 = vmatprep.mubr.msk.bf16.mxu1 %vm799_vm3, %v5193_v60  ;;  %v642_v55 = vsel %vm4924_vm4, %v637_v37, %v641_v45  ;;  %v647_v57 = vrot.slane %v646_v38, 4  ;;  %v660_v13 = vor.u32 %v659_v46, %v656_v26  ;;  %v681_v42 = vshll.u32 %v5186_v62, 16  ;;  %v5219_v26 = vld [vmem:[%s4886_s18 + $0xac] sm:$0xf] }
  0x4b   : > { %v669_v36 = vrot.slane %v667_v7, 4  ;;  %v675_v20 = vrot.slane %v673_v15, 5  ;;  %v680_v59 = vrot.slane %v678_v52, 4  ;;  %v687_v54 = vshll.u32 %v5196_v50, 16  ;;  %6112 = vst [vmem:[#allocation18_spill] sm:$0xff] %v5219_v26 }
  0x4c   : > { %v652_v60 = vsel %vm4924_vm4, %v647_v57, %v651_v5  ;;  %v661_v27 = vrot.slane %v660_v13, 4  ;;  %v683_v51 = vrot.slane %v681_v42, 5  ;;  %v691_v45 = vshrl.u32 %v5196_v50, 16 }
  0x4d   : > { %v5221_v37 = vcombine.low %v642_v55, %v652_v60  ;;  %v670_v38 = vor.u32 %v669_v36, %v665_v24  ;;  %v689_v7 = vrot.slane %v687_v54, 5  ;;  %v697_v15 = vshll.u32 %v5208_v3, 16  ;;  %v5238_v36 = vld [vmem:[%s4886_s18 + $0xb4] sm:$0xf]  ;;  %v5251_v3 = vld [vmem:[%s4886_s18 + $0xbc] sm:$0x1] }
  0x4e   : > { %v666_v46 = vsel %vm4924_vm4, %v661_v27, %v665_v24  ;;  %v684_v52 = vor.u32 %v683_v51, %v680_v59  ;;  %v693_v62 = vrot.slane %v691_v45, 4  ;;  %v702_v5 = vshrl.u32 %v5213_v33, 16  ;;  %6114 = vst [vmem:[#allocation20_spill] sm:$0xff] %v5238_v36  ;;  %6117 = vst [vmem:[#allocation23_spill] sm:$0xff] %v5251_v3 }
  0x4f   : > { %6113 = vst [vmem:[#allocation19_spill] sm:$0xff] %v5221_v37  ;;  %4244 = vmatprep.mubr.msk.bf16.mxu0 %vm799_vm3, %v5221_v37  ;;  %4109 = vmatmul.mubr.msk.bf16.gmra.mrb[20].mxu1 %vm799_vm3, %v5221_v37  ;;  %v671_v60 = vrot.slane %v670_v38, 4  ;;  %v699_v55 = vrot.slane %v697_v15, 5  ;;  %v705_v57 = vshll.u32 %v5213_v33, 16  ;;  %v711_v24 = vshll.u32 %v5219_v26, 16 }
  0x50   : > { %v685_v51 = vrot.slane %v684_v52, 4  ;;  %v694_v27 = vor.u32 %v693_v62, %v689_v7  ;;  %v704_v13 = vrot.slane %v702_v5, 4  ;;  %v715_v42 = vshrl.u32 %v5219_v26, 16  ;;  %v5244_v15 = vld [vmem:[%s4886_s18 + $0xb8] sm:$0xf] }
  0x51   : > { %v676_v59 = vsel %vm4924_vm4, %v671_v60, %v675_v20  ;;  %v707_v54 = vrot.slane %v705_v57, 5  ;;  %v713_v45 = vrot.slane %v711_v24, 5  ;;  %v721_v38 = vshll.u32 %v5227_v6, 16  ;;  %6115 = vst [vmem:[#allocation21_spill] sm:$0xff] %v5244_v15 }
  0x52   : > { %v5246_v37 = vcombine.low %v666_v46, %v676_v59  ;;  %v690_v62 = vsel %vm4924_vm4, %v685_v51, %v689_v7  ;;  %v695_v52 = vrot.slane %v694_v27, 4  ;;  %v717_v5 = vrot.slane %v715_v42, 4  ;;  %v5264_v51 = vld [vmem:[%s4886_s18 + $0xc0] sm:$0xf] }
  0x53   : > { %v708_v26 = vor.u32 %v707_v54, %v704_v13  ;;  %v723_v33 = vrot.slane %v721_v38, 5  ;;  %v726_v20 = vshrl.u32 %v5238_v36, 16  ;;  %v729_v60 = vshll.u32 %v5238_v36, 16  ;;  %6118 = vst [vmem:[#allocation24_spill] sm:$0xff] %v5264_v51  ;;  %v5269_v54 = vld [vmem:[%s4886_s18 + $0xc4] sm:$0xf] }
  0x54   : > { %6116 = vst [vmem:[#allocation22_spill] sm:$0xff] %v5246_v37  ;;  %4245 = vmatmul.mubr.msk.bf16.gmra.mrb[20].mxu0 %vm799_vm3, %v5246_v37  ;;  %4112 = vmatprep.mubr.msk.bf16.mxu1 %vm799_vm3, %v5246_v37  ;;  %v700_v7 = vsel %vm4924_vm4, %v695_v52, %v699_v55  ;;  %v718_v46 = vor.u32 %v717_v5, %v713_v45  ;;  %v735_v57 = vshll.u32 %v5244_v15, 16  ;;  %v739_v24 = vshrl.u32 %v5244_v15, 16 }
  0x55   : > { %v5266_v27 = vcombine.low %v690_v62, %v700_v7  ;;  %v709_v13 = vrot.slane %v708_v26, 4  ;;  %v728_v42 = vrot.slane %v726_v20, 4  ;;  %v731_v59 = vrot.slane %v729_v60, 5  ;;  %v5279_v26 = vld [vmem:[%s4886_s18 + $0xc8] sm:$0x1] }
  0x56   : > { %v719_v38 = vrot.slane %v718_v46, 4  ;;  %v737_v37 = vrot.slane %v735_v57, 5  ;;  %v741_v36 = vrot.slane %v739_v24, 4  ;;  %v745_v55 = vshll.u32 %v5251_v3, 16 }
  0x57   : > { %6119 = vst [vmem:[#allocation25_spill] sm:$0xff] %v5266_v27  ;;  %4248 = vmatprep.mubr.msk.bf16.mxu0 %vm799_vm3, %v5266_v27  ;;  %4113 = vmatmul.mubr.msk.bf16.gmra.mrb[24].mxu1 %vm799_vm3, %v5266_v27  ;;  %v714_v62 = vsel %vm4924_vm4, %v709_v13, %v713_v45  ;;  %v732_v52 = vor.u32 %v731_v59, %v728_v42  ;;  %v1937_v5 = vshrl.u32 %v5264_v51, 16  ;;  %v1940_v20 = vshll.u32 %v5264_v51, 16  ;;  %v4762_v51 = vld [vmem:[%s6057_s3 + $0x28] sm:$0xff]  }
  0x58   : > { %v724_v60 = vsel %vm4924_vm4, %v719_v38, %v723_v33  ;;  %v742_v7 = vor.u32 %v741_v36, %v737_v37  ;;  %v747_v46 = vrot.slane %v745_v55, 5  ;;  %v1946_v57 = vshll.u32 %v5269_v54, 16 }
  0x59   : > { %v5286_v24 = vcombine.low %v714_v62, %v724_v60  ;;  %v733_v27 = vrot.slane %v732_v52, 4  ;;  %v1939_v3 = vrot.slane %v1937_v5, 4  ;;  %v1942_v15 = vrot.slane %v1940_v20, 5 }
  0x5a   : > { %v743_v45 = vrot.slane %v742_v7, 4  ;;  %v1948_v13 = vrot.slane %v1946_v57, 5  ;;  %v1950_v42 = vshrl.u32 %v5269_v54, 16  ;;  %v1956_v59 = vshll.u32 %v5279_v26, 16 }
  0x5b   : > { %4116 = vmatprep.mubr.msk.bf16.mxu1 %vm799_vm3, %v5286_v24  ;;  %v738_v33 = vsel %vm4924_vm4, %v733_v27, %v737_v37  ;;  %v1943_v36 = vor.u32 %v1942_v15, %v1939_v3  ;;  %v3704_v38 = vrot.slane %v4900_v16, 9  ;;  %v1333_v55 = vrot.slane %v4903_v18, 5 }
  0x5c   : > { %4249 = vmatmul.mubr.msk.bf16.gmra.mrb[24].mxu0 %vm799_vm3, %v5286_v24  ;;  %v748_v62 = vsel %vm4924_vm4, %v743_v45, %v747_v46  ;;  %v1952_v52 = vrot.slane %v1950_v42, 4  ;;  %v1958_v5 = vrot.slane %v1956_v59, 5  ;;  %v3705_v20 = vrot.slane %v4920_v34, 9 }
  0x5d   : > { %v5307_v60 = vcombine.low %v738_v33, %v748_v62  ;;  %v1944_v7 = vrot.slane %v1943_v36, 4  ;;  %v1334_v3 = vsel %vm5292_vm7, %v3704_v38, %v1333_v55  ;;  %v1335_v37 = vrot.slane %v1333_v55, 4 }
  0x5e   : > { %v1953_v16 = vor.u32 %v1952_v52, %v1948_v13  ;;  %v6122_v18 = vrot.slane %v4933_v40, 5  ;;  %v5319_v57 = vcombine.low %v4920_v34, %v4933_v40  ;;  %v6124_v42 = vrot.slane %v4906_v19, 5 }
  0x5f   : > { %4252 = vmatprep.mubr.msk.bf16.mxu0 %vm799_vm3, %v5307_v60  ;;  %4117 = vmatmul.mubr.msk.bf16.gmra.mrb[28].mxu1 %vm799_vm3, %v5307_v60  ;;  %v1949_v45 = vsel %vm4924_vm4, %v1944_v7, %v1948_v13  ;;  %v3706_v33 = vrot.slane %v4947_v58, 9  ;;  %v1347_v36 = vrot.slane %v4952_v63, 5  ;;  %v6125_v40 = vcombine.low %v4889_v9, %v4892_v10 }
  0x60   : > { %v1341_v15 = vsel %vm5292_vm7, %v3705_v20, %v6122_v18  ;;  %v6123_v27 = vmov %v6122_v18  ;;  %v1337_v59 = vsel %vm5292_vm7, %v1335_v37, %v6124_v42  ;;  %v1954_v34 = vrot.slane %v1953_v16, 4 }
  0x61   : > { %v1342_v46 = vrot.slane %v6123_v27, 4  ;;  %4122 = vmatprep.mubr.msk.bf16.mxu1 %vm799_vm3, %v6125_v40  ;;  %v5337_v38 = vcombine.low %v1334_v3, %v1337_v59  ;;  %v6126_v55 = vrot.slane %v4937_v47, 5  ;;  %v1350_v13 = vrot.slane %v4960_v4, 5 }
  0x62   : > { %v1348_v52 = vsel %vm5292_vm7, %v3706_v33, %v1347_v36  ;;  %v1349_v20 = vrot.slane %v1347_v36, 4  ;;  %v5350_v9 = vcombine.low %v4947_v58, %v4952_v63  ;;  %v1959_v10 = vsel %vm4924_vm4, %v1954_v34, %v1958_v5 }
  0x63   : > { %v1344_v19 = vsel %vm5292_vm7, %v1342_v46, %v6126_v55  ;;  %v3707_v47 = vrot.slane %v4966_v14, 9  ;;  %v1354_v7 = vrot.slane %v4973_v28, 5  ;;  %v1357_v3 = vrot.slane %v4980_v32, 5 }
  0x64   : > { %v5344_v62 = vcombine.low %v1341_v15, %v1344_v19  ;;  %v5357_v4 = vcombine.low %v1949_v45, %v1959_v10  ;;  %v1351_v37 = vsel %vm5292_vm7, %v1349_v20, %v1350_v13  ;;  %v5363_v16 = vcombine.low %v4966_v14, %v4973_v28 }
  0x65   : > { %v3708_v58 = vrot.slane %v4988_v48, 9  ;;  %v5366_v63 = vcombine.low %v1348_v52, %v1351_v37  ;;  %v1355_v5 = vsel %vm5292_vm7, %v3707_v47, %v1354_v7  ;;  %v1356_v18 = vrot.slane %v1354_v7, 4 }
  0x66   : > { %v1361_v15 = vrot.slane %v4994_v53, 5  ;;  %4253 = vmatmul.mubr.msk.bf16.gmra.mrb[28].mxu0 %vm799_vm3, %v5357_v4  ;;  %v1364_v32 = vrot.slane %v5006_v1, 5  ;;  %v5376_v27 = vcombine.low %v4988_v48, %v4994_v53  ;;  %v3709_v14 = vrot.slane %v5011_v12, 9 }
  0x67   : > { %v1368_v28 = vrot.slane %v5018_v23, 5  ;;  %4258 = vmatprep.mubr.msk.bf16.mxu0 %vm799_vm3, %v5337_v38  ;;  %v1358_v46 = vsel %vm5292_vm7, %v1356_v18, %v1357_v3  ;;  %v1371_v1 = vrot.slane %v5035_v8, 5  ;;  %4123 = vmatmul.mubr.msk.bf16.vlgmr.msra.gmra.mrb[0].mxu1 %vm799_vm3, %v4930_v39  ;;  %v5395_v33 = vcombine.low %v5011_v12, %v5018_v23 }
  0x68   : > { %v1362_v45 = vsel %vm5292_vm7, %v3708_v58, %v1361_v15  ;;  %v1363_v42 = vrot.slane %v1361_v15, 4  ;;  %v5389_v48 = vcombine.low %v1355_v5, %v1358_v46  ;;  %4126 = vmatprep.mubr.msk.bf16.mxu1 %vm799_vm3, %v5319_v57  ;;  %v3710_v8 = vrot.slane %v5040_v41, 9 }
  0x69   : > { %v1369_v53 = vsel %vm5292_vm7, %v3709_v14, %v1368_v28  ;;  %v1370_v59 = vrot.slane %v1368_v28, 4  ;;  %v1375_v34 = vrot.slane %v5045_v49, 5  ;;  %v1378_v40 = vrot.slane %v5058_v0, 5 }
  0x6a   : > { %v1365_v36 = vsel %vm5292_vm7, %v1363_v42, %v1364_v32  ;;  %v5410_v12 = vcombine.low %v5040_v41, %v5045_v49  ;;  %v3711_v23 = vrot.slane %v5062_v11, 9  ;;  %v1382_v10 = vrot.slane %v5067_v25, 5 }
  0x6b   : > { %v5404_v55 = vcombine.low %v1362_v45, %v1365_v36  ;;  %v1372_v19 = vsel %vm5292_vm7, %v1370_v59, %v1371_v1  ;;  %v1376_v52 = vsel %vm5292_vm7, %v3710_v8, %v1375_v34  ;;  %v1377_v20 = vrot.slane %v1375_v34, 4  ;;  %v6128_v59 = vld [vmem:[#allocation12_spill] sm:$0xff] }
  0x6c   : > { %v5413_v13 = vcombine.low %v1369_v53, %v1372_v19  ;;  %v1385_v0 = vrot.slane %v5081_v43, 5  ;;  %v5421_v47 = vcombine.low %v5062_v11, %v5067_v25  ;;  %v3712_v7 = vrot.slane %v5086_v56, 9  ;;  %v5433_v43 = vld [vmem:[%s6055_s1 + $0xe] sm:$0x3]  ;;  %v6129_v19 = vld [vmem:[#allocation13_spill] sm:$0xff] }
  0x6d   : > { %v1389_v41 = vrot.slane %v5092_v61, 5  ;;  %v1379_v49 = vsel %vm5292_vm7, %v1377_v20, %v1378_v40  ;;  %v1383_v3 = vsel %vm5292_vm7, %v3711_v23, %v1382_v10  ;;  %v1384_v37 = vrot.slane %v1382_v10, 4  ;;  %v6130_v10 = vld [vmem:[#allocation14_spill] sm:$0xff] }
  0x6e   : > { %v1392_v58 = vrot.slane %v5100_v22, 5  ;;  %4259 = vmatmul.mubr.msk.bf16.vlgmr.msra.gmra.mrb[0].mxu0 %vm799_vm3, %v5344_v62  ;;  %v5437_v11 = vcombine.low %v1376_v52, %v1379_v49  ;;  %v5443_v18 = vcombine.low %v5086_v56, %v5092_v61  ;;  %v3713_v15 = vrot.slane %v5105_v31, 9 }
  0x6f   : > { %v1390_v25 = vsel %vm5292_vm7, %v3712_v7, %v1389_v41  ;;  %v1391_v5 = vrot.slane %v1389_v41, 4  ;;  %4291 = vmatpush3.bf16.msra.mxu0 %v4912_v21  ;;  %4262 = vmatprep.mubr.msk.bf16.mxu0 %vm799_vm3, %v5366_v63  ;;  %v1386_v22 = vsel %vm5292_vm7, %v1384_v37, %v1385_v0  ;;  %v1396_v32 = vrot.slane %v5119_v44, 5  ;;  %v6131_v41 = vld [vmem:[#allocation16_spill] sm:$0xff] }
  0x70   : > { %v1399_v14 = vrot.slane %v5127_v17, 5  ;;  %4127 = vmatmul.mubr.msk.bf16.gmra.mrb[4].mxu1 %vm799_vm3, %v5350_v9  ;;  %v5455_v28 = vcombine.low %v1383_v3, %v1386_v22  ;;  %v5461_v56 = vcombine.low %v5105_v31, %v5119_v44  ;;  %v3714_v61 = vrot.slane %v5134_v30, 9  ;;  %4701 = vmatprep.subr.msk.bf16.mxu0 %vm848_vm0, %v5433_v43  ;;  %v6127_v44 = vld [vmem:[#allocation10_spill] sm:$0xff] }
  0x71   : > { %v1393_v21 = vsel %vm5292_vm7, %v1391_v5, %v1392_v58  ;;  %4130 = vmatprep.mubr.msk.bf16.mxu1 %vm799_vm3, %v5363_v16  ;;  %v1397_v46 = vsel %vm5292_vm7, %v3713_v15, %v1396_v32  ;;  %v1398_v45 = vrot.slane %v1396_v32, 4  ;;  %v1403_v42 = vrot.slane %v5139_v29, 5 }
  0x72   : > { %v5468_v17 = vcombine.low %v1390_v25, %v1393_v21  ;;  %v1406_v1 = vrot.slane %v5161_v2, 5  ;;  %v5476_v31 = vcombine.low %v5134_v30, %v5139_v29  ;;  %v3715_v53 = vrot.slane %v6127_v44, 9  ;;  %v6132_v25 = vld [vmem:[#allocation17_spill] sm:$0xff] }
  0x73   : > { %v1410_v36 = vrot.slane %v6128_v59, 5  ;;  %v1400_v8 = vsel %vm5292_vm7, %v1398_v45, %v1399_v14  ;;  %v1404_v34 = vsel %vm5292_vm7, %v3714_v61, %v1403_v42  ;;  %v1405_v40 = vrot.slane %v1403_v42, 4  ;;  %v6133_v14 = vld [vmem:[#allocation18_spill] sm:$0xff]  ;;  %v6135_v42 = vld [vmem:[#allocation21_spill] sm:$0xff] }
  0x74   : > { %v1413_v23 = vrot.slane %v6129_v19, 5  ;;  %v5485_v52 = vcombine.low %v1397_v46, %v1400_v8  ;;  %v5491_v29 = vcombine.low %v6127_v44, %v6128_v59  ;;  %v3716_v0 = vrot.slane %v6130_v10, 9  ;;  %v6134_v46 = vld [vmem:[#allocation20_spill] sm:$0xff] }
  0x75   : > { %v1411_v2 = vsel %vm5292_vm7, %v3715_v53, %v1410_v36  ;;  %v1412_v30 = vrot.slane %v1410_v36, 4  ;;  %v1407_v20 = vsel %vm5292_vm7, %v1405_v40, %v1406_v1  ;;  %v1417_v7 = vrot.slane %v5196_v50, 5  ;;  %v6136_v36 = vld [vmem:[#allocation23_spill] sm:$0xff] }
  0x76   : > { %v1420_v49 = vrot.slane %v6131_v41, 5  ;;  %4263 = vmatmul.mubr.msk.bf16.gmra.mrb[4].mxu0 %vm799_vm3, %v5389_v48  ;;  %v5500_v3 = vcombine.low %v1404_v34, %v1407_v20  ;;  %v5506_v58 = vcombine.low %v6130_v10, %v5196_v50  ;;  %v3717_v5 = vrot.slane %v6132_v25, 9 }
  0x77   : > { %v1414_v37 = vsel %vm5292_vm7, %v1412_v30, %v1413_v23  ;;  %4266 = vmatprep.mubr.msk.bf16.mxu0 %vm799_vm3, %v5404_v55  ;;  %v1418_v15 = vsel %vm5292_vm7, %v3716_v0, %v1417_v7  ;;  %v1419_v32 = vrot.slane %v1417_v7, 4  ;;  %v1424_v21 = vrot.slane %v6133_v14, 5  ;;  %v3752_v0 = vld [vmem:[%s6055_s1 + $0x6] sm:$0x3] }
  0x78   : > { %v5511_v22 = vcombine.low %v1411_v2, %v1414_v37  ;;  %4131 = vmatmul.mubr.msk.bf16.gmra.mrb[8].mxu1 %vm799_vm3, %v5376_v27  ;;  %v1427_v61 = vrot.slane %v5227_v6, 5  ;;  %v5521_v50 = vcombine.low %v6132_v25, %v6133_v14  ;;  %v3718_v45 = vrot.slane %v6134_v46, 9  ;;  %v6137_v2 = vld [vmem:[#allocation24_spill] sm:$0xff] }
  0x79   : > { %v1431_v1 = vrot.slane %v6135_v42, 5  ;;  %4134 = vmatprep.mubr.msk.bf16.mxu1 %vm799_vm3, %v5395_v33  ;;  %v1421_v44 = vsel %vm5292_vm7, %v1419_v32, %v1420_v49  ;;  %v1425_v53 = vsel %vm5292_vm7, %v3717_v5, %v1424_v21  ;;  %v1426_v59 = vrot.slane %v1424_v21, 4  ;;  %v6138_v49 = vld [vmem:[#allocation7_spill] sm:$0xff] }
  0x7a   : > { %v1434_v6 = vrot.slane %v6136_v36, 5  ;;  %v5532_v8 = vcombine.low %v1418_v15, %v1421_v44  ;;  %v5538_v19 = vcombine.low %v6134_v46, %v6135_v42  ;;  %v3788_v30 = vrot.slane %v6137_v2, 9 }
  0x7b   : > { %v1432_v34 = vsel %vm5292_vm7, %v3718_v45, %v1431_v1  ;;  %v1433_v40 = vrot.slane %v1431_v1, 4  ;;  %v1428_v23 = vsel %vm5292_vm7, %v1426_v59, %v1427_v61  ;;  %v2167_v20 = vrot.slane %v5269_v54, 5  ;;  %v4766_v61 = vld [vmem:[%s4886_s18 + $0x8] sm:$0x1]  ;;  %v4767_v45 = vld [vmem:[%s4886_s18] sm:$0xf] }
  0x7c   : > { %v2170_v10 = vrot.slane %v5279_v26, 5  ;;  %v5548_v7 = vcombine.low %v1425_v53, %v1428_v23  ;;  %v1535_v37 = vsel %vm848_vm0, %v6138_v49, 0  ;;  %v5562_v26 = vcombine.low %v6137_v2, %v5269_v54  ;;  %v4765_v54 = vld [vmem:[%s4886_s18 + $0x4] sm:$0xf] }
  0x7d   : > { %v1435_v41 = vsel %vm5292_vm7, %v1433_v40, %v1434_v6  ;;  %v2168_v5 = vsel %vm5292_vm7, %v3788_v30, %v2167_v20  ;;  %v2169_v15 = vrot.slane %v2167_v20, 4  ;;  %4155 = vmatpush3.bf16.msra.mxu1 %v1535_v37  ;;  %v1326_v21 = vrot.slane %v4765_v54, 5  ;;  %v6139_v23 = vld [vmem:[#allocation2_spill] sm:$0xff]  ;;  %v6140_v30 = vld [vmem:[#allocation3_spill] sm:$0xff]  ;;  %v6142_v20 = vld [vmem:[#allocation5_spill] sm:$0xff] }
  0x7e   : > { %v5554_v25 = vcombine.low %v1432_v34, %v1435_v41  ;;  %4267 = vmatmul.mubr.msk.bf16.gmra.mrb[8].mxu0 %vm799_vm3, %v5413_v13  ;;  %4697 = vmatprep.subr.msk.bf16.mxu1 %vm848_vm0, %v3752_v0  ;;  %v1329_v46 = vrot.slane %v4766_v61, 5  ;;  %v3703_v42 = vrot.slane %v4767_v45, 9  ;;  %v1741_v36 = vsel %vm848_vm0, %v3752_v0, 0  ;;  %v3844_v34 = vld [vmem:[%s6055_s1 + $0x10] sm:$0x3]  ;;  %v6149_v0 = vld [vmem:[#allocation22_spill] sm:$0xff] }
  0x7f   : > { %4270 = vmatprep.mubr.msk.bf16.mxu0 %vm799_vm3, %v5437_v11  ;;  %v2171_v32 = vsel %vm5292_vm7, %v2169_v15, %v2170_v10  ;;  %v1328_v1 = vrot.slane %v1326_v21, 4  ;;  %v2615_v6 = vsel %vm848_vm0, %v5433_v43, 0  ;;  %v5684_v43 = vld [vmem:[%s4886_s18 + $0xd0] sm:$0xf]  ;;  %v2827_v2 = vsel %vm848_vm0, %v3844_v34, 0  ;;  %v6145_v10 = vld [vmem:[#allocation9_spill] sm:$0xff] }
  0x80   : > { %4135 = vmatmul.mubr.msk.bf16.gmra.mrb[12].mxu1 %vm799_vm3, %v5410_v12  ;;  %v5571_v14 = vcombine.low %v2168_v5, %v2171_v32  ;;  %v1327_v44 = vsel %vm5292_vm7, %v3703_v42, %v1326_v21  ;;  %v2592_v41 = vshll.u32 %v5684_v43, 16  ;;  %v360_v5 = vld [vmem:[%s4886_s18 + $0xd4] sm:$0x1]  ;;  %v6150_v15 = vld [vmem:[#allocation25_spill] sm:$0xff] }
  0x81   : > { %4138 = vmatprep.mubr.msk.bf16.mxu1 %vm799_vm3, %v5421_v47  ;;  %v1330_v53 = vsel %vm5292_vm7, %v1328_v1, %v1329_v46  ;;  %v2602_v21 = vshll.u32 %v360_v5, 16 }
  0x82   : > { %v3720_v59 = vcombine.low %v1327_v44, %v1330_v53  ;;  %v2594_v49 = vrot.slane %v2592_v41, 5  ;;  %v5875_v41 = vld [vmem:[%s6056_s2] ss:$0 sm:$0xff] }
  0x83   : > { %v2604_v61 = vrot.slane %v2602_v21, 5 }
  0x86   : > { %4271 = vmatmul.mubr.msk.bf16.gmra.mrb[12].mxu0 %vm799_vm3, %v5455_v28 }
  0x87   : > { %4274 = vmatprep.mubr.msk.bf16.mxu0 %vm799_vm3, %v5468_v17 }
  0x88   : > { %4139 = vmatmul.mubr.msk.bf16.gmra.mrb[16].mxu1 %vm799_vm3, %v5443_v18 }
  0x89   : > { %4142 = vmatprep.mubr.msk.bf16.mxu1 %vm799_vm3, %v5461_v56 }
  0x8e   : > { %4275 = vmatmul.mubr.msk.bf16.gmra.mrb[16].mxu0 %vm799_vm3, %v5485_v52 }
  0x8f   : > { %4278 = vmatprep.mubr.msk.bf16.mxu0 %vm799_vm3, %v5500_v3 }
  0x90   : > { %4143 = vmatmul.mubr.msk.bf16.gmra.mrb[20].mxu1 %vm799_vm3, %v5476_v31 }
  0x91   : > { %4146 = vmatprep.mubr.msk.bf16.mxu1 %vm799_vm3, %v5491_v29 }
  0x96   : > { %4279 = vmatmul.mubr.msk.bf16.gmra.mrb[20].mxu0 %vm799_vm3, %v5511_v22 }
  0x97   : > { %4282 = vmatprep.mubr.msk.bf16.mxu0 %vm799_vm3, %v5532_v8 }
  0x98   : > { %4147 = vmatmul.mubr.msk.bf16.gmra.mrb[24].mxu1 %vm799_vm3, %v5506_v58 }
  0x99   : > { %4150 = vmatprep.mubr.msk.bf16.mxu1 %vm799_vm3, %v5521_v50 }
  0x9e   : > { %4283 = vmatmul.mubr.msk.bf16.gmra.mrb[24].mxu0 %vm799_vm3, %v5548_v7 }
  0x9f   : > { %4286 = vmatprep.mubr.msk.bf16.mxu0 %vm799_vm3, %v5554_v25 }
  0xa0   : > { %4151 = vmatmul.mubr.msk.bf16.gmra.mrb[28].mxu1 %vm799_vm3, %v5538_v19 }
  0xa1   : > { %4156 = vmatprep.mubr.msk.bf16.mxu1 %vm799_vm3, %v3720_v59 }
  0xa6   : > { %4287 = vmatmul.mubr.msk.bf16.gmra.mrb[28].mxu0 %vm799_vm3, %v5571_v14 }
  0xa7   : > { %4292 = vmatprep.mubr.msk.bf16.mxu0 %vm799_vm3, %v5319_v57 }
  0xa8   : > { %4157 = vmatmul.mubr.msk.bf16.vlgmr.msra.gmra.mrb[0].mxu1 %vm799_vm3, %v5337_v38  ;;  %v5681_v38 = vld [vmem:[%s4886_s18 + $0xcc] sm:$0xf] }
  0xa9   : > { %4160 = vmatprep.mubr.msk.bf16.mxu1 %vm799_vm3, %v5344_v62  ;;  %4189 = vmatpush3.bf16.msra.mxu1 %v1741_v36  ;;  %v3808_v40 = vcombine.low %v5681_v38, %v5684_v43 }
  0xaa   : > { %4392 = vmatprep.subr.bf16.mxu1 %v4757_v35 }
  0xae   : > { %4293 = vmatmul.mubr.msk.bf16.vlgmr.msra.gmra.mrb[0].mxu0 %vm799_vm3, %v5350_v9 }
  0xaf   : > { %4325 = vmatpush3.bf16.msra.mxu0 %v2615_v6  ;;  %4296 = vmatprep.mubr.msk.bf16.mxu0 %vm799_vm3, %v5363_v16 }
  0xb0   : > { %4161 = vmatmul.mubr.msk.bf16.gmra.mrb[4].mxu1 %vm799_vm3, %v5366_v63  ;;  %4702 = vmatprep.subr.msk.bf16.mxu0 %vm848_vm0, %v3844_v34 }
  0xb1   : > { %4164 = vmatprep.mubr.msk.bf16.mxu1 %vm799_vm3, %v5389_v48 }
  0xb6   : > { %4297 = vmatmul.mubr.msk.bf16.gmra.mrb[4].mxu0 %vm799_vm3, %v5376_v27 }
  0xb7   : > { %4300 = vmatprep.mubr.msk.bf16.mxu0 %vm799_vm3, %v5395_v33 }
  0xb8   : > { %4165 = vmatmul.mubr.msk.bf16.gmra.mrb[8].mxu1 %vm799_vm3, %v5404_v55 }
  0xb9   : > { %4168 = vmatprep.mubr.msk.bf16.mxu1 %vm799_vm3, %v5413_v13 }
  0xbe   : > { %4301 = vmatmul.mubr.msk.bf16.gmra.mrb[8].mxu0 %vm799_vm3, %v5410_v12 }
  0xbf   : > { %4304 = vmatprep.mubr.msk.bf16.mxu0 %vm799_vm3, %v5421_v47 }
  0xc0   : > { %4169 = vmatmul.mubr.msk.bf16.gmra.mrb[12].mxu1 %vm799_vm3, %v5437_v11 }
  0xc1   : > { %4172 = vmatprep.mubr.msk.bf16.mxu1 %vm799_vm3, %v5455_v28 }
  0xc6   : > { %4305 = vmatmul.mubr.msk.bf16.gmra.mrb[12].mxu0 %vm799_vm3, %v5443_v18 }
  0xc7   : > { %4308 = vmatprep.mubr.msk.bf16.mxu0 %vm799_vm3, %v5461_v56 }
  0xc8   : > { %4173 = vmatmul.mubr.msk.bf16.gmra.mrb[16].mxu1 %vm799_vm3, %v5468_v17 }
  0xc9   : > { %4176 = vmatprep.mubr.msk.bf16.mxu1 %vm799_vm3, %v5485_v52 }
  0xce   : > { %4309 = vmatmul.mubr.msk.bf16.gmra.mrb[16].mxu0 %vm799_vm3, %v5476_v31 }
  0xcf   : > { %4312 = vmatprep.mubr.msk.bf16.mxu0 %vm799_vm3, %v5491_v29 }
  0xd0   : > { %4177 = vmatmul.mubr.msk.bf16.gmra.mrb[20].mxu1 %vm799_vm3, %v5500_v3 }
  0xd1   : > { %4180 = vmatprep.mubr.msk.bf16.mxu1 %vm799_vm3, %v5511_v22 }
  0xd6   : > { %4313 = vmatmul.mubr.msk.bf16.gmra.mrb[20].mxu0 %vm799_vm3, %v5506_v58 }
  0xd7   : > { %4316 = vmatprep.mubr.msk.bf16.mxu0 %vm799_vm3, %v5521_v50 }
  0xd8   : > { %4181 = vmatmul.mubr.msk.bf16.gmra.mrb[24].mxu1 %vm799_vm3, %v5532_v8 }
  0xd9   : > { %4184 = vmatprep.mubr.msk.bf16.mxu1 %vm799_vm3, %v5548_v7 }
  0xde   : > { %4317 = vmatmul.mubr.msk.bf16.gmra.mrb[24].mxu0 %vm799_vm3, %v5538_v19 }
  0xdf   : > { %4320 = vmatprep.mubr.msk.bf16.mxu0 %vm799_vm3, %v5562_v26 }
  0xe0   : > { %4185 = vmatmul.mubr.msk.bf16.gmra.mrb[28].mxu1 %vm799_vm3, %v5554_v25 }
  0xe1   : > { %4190 = vmatprep.mubr.msk.bf16.mxu1 %vm799_vm3, %v4930_v39  ;;  %v6141_v39 = vld [vmem:[#allocation4_spill] sm:$0xff] }
  0xe6   : > { %4321 = vmatmul.mubr.msk.bf16.gmra.mrb[28].mxu0 %vm799_vm3, %v3808_v40 }
  0xe7   : > { %4326 = vmatprep.mubr.msk.bf16.mxu0 %vm799_vm3, %v6139_v23 }
  0xe8   : > { %4191 = vmatmul.mubr.msk.bf16.vlgmr.msra.gmra.mrb[0].mxu1 %vm799_vm3, %v5319_v57  ;;  %v6143_v57 = vld [vmem:[#allocation6_spill] sm:$0xff] }
  0xe9   : > { %4194 = vmatprep.mubr.msk.bf16.mxu1 %vm799_vm3, %v5350_v9  ;;  %v6144_v9 = vld [vmem:[#allocation8_spill] sm:$0xff]  ;;  %4393 = vmatpush3.bf16.msra.mxu1 %v4757_v35 }
  0xee   : > { %4327 = vmatmul.mubr.msk.bf16.vlgmr.msra.gmra.mrb[0].mxu0 %vm799_vm3, %v6140_v30 }
  0xef   : > { %4359 = vmatpush3.bf16.msra.mxu0 %v2827_v2  ;;  %4330 = vmatprep.mubr.msk.bf16.mxu0 %vm799_vm3, %v6141_v39 }
  0xf0   : > { %4195 = vmatmul.mubr.msk.bf16.gmra.mrb[4].mxu1 %vm799_vm3, %v5363_v16  ;;  %v6146_v16 = vld [vmem:[#allocation11_spill] sm:$0xff] }
  0xf1   : > { %4198 = vmatprep.mubr.msk.bf16.mxu1 %vm799_vm3, %v5376_v27  ;;  %v6147_v27 = vld [vmem:[#allocation15_spill] sm:$0xff] }
  0xf6   : > { %4331 = vmatmul.mubr.msk.bf16.gmra.mrb[4].mxu0 %vm799_vm3, %v6142_v20 }
  0xf7   : > { %4334 = vmatprep.mubr.msk.bf16.mxu0 %vm799_vm3, %v6143_v57 }
  0xf8   : > { %4199 = vmatmul.mubr.msk.bf16.gmra.mrb[8].mxu1 %vm799_vm3, %v5395_v33  ;;  %v6148_v33 = vld [vmem:[#allocation19_spill] sm:$0xff] }
  0xf9   : > { %4202 = vmatprep.mubr.msk.bf16.mxu1 %vm799_vm3, %v5410_v12  ;;  %v2583_v12 = vshrl.u32 %v5681_v38, 16 }
  0xfe   : > { %4335 = vmatmul.mubr.msk.bf16.gmra.mrb[8].mxu0 %vm799_vm3, %v6144_v9 }
  0xff   : > { %4338 = vmatprep.mubr.msk.bf16.mxu0 %vm799_vm3, %v6145_v10 }
 0x100   : > { %4203 = vmatmul.mubr.msk.bf16.gmra.mrb[12].mxu1 %vm799_vm3, %v5421_v47  ;;  %v2586_v47 = vshll.u32 %v5681_v38, 16 }
 0x101   : > { %4206 = vmatprep.mubr.msk.bf16.mxu1 %vm799_vm3, %v5443_v18  ;;  %v2596_v18 = vshrl.u32 %v5684_v43, 16 }
 0x103   : > { %v2598_v37 = vrot.slane %v2596_v18, 4 }
 0x105   : > { %v2599_v54 = vor.u32 %v2598_v37, %v2594_v49 }
 0x106   : > { %4339 = vmatmul.mubr.msk.bf16.gmra.mrb[12].mxu0 %vm799_vm3, %v6146_v16 }
 0x107   : > { %4342 = vmatprep.mubr.msk.bf16.mxu0 %vm799_vm3, %v6147_v27 }
 0x108   : > { %4207 = vmatmul.mubr.msk.bf16.gmra.mrb[16].mxu1 %vm799_vm3, %v5461_v56  ;;  %v2585_v56 = vrot.slane %v2583_v12, 4 }
 0x109   : > { %4210 = vmatprep.mubr.msk.bf16.mxu1 %vm799_vm3, %v5476_v31  ;;  %v2588_v31 = vrot.slane %v2586_v47, 5 }
 0x10b   : > { %v2589_v32 = vor.u32 %v2588_v31, %v2585_v56 }
 0x10e   : > { %4343 = vmatmul.mubr.msk.bf16.gmra.mrb[16].mxu0 %vm799_vm3, %v6148_v33 }
 0x10f   : > { %4346 = vmatprep.mubr.msk.bf16.mxu0 %vm799_vm3, %v6149_v0 }
 0x110   : > { %4211 = vmatmul.mubr.msk.bf16.gmra.mrb[20].mxu1 %vm799_vm3, %v5491_v29  ;;  %v2590_v29 = vrot.slane %v2589_v32, 4 }
 0x111   : > { %4214 = vmatprep.mubr.msk.bf16.mxu1 %vm799_vm3, %v5506_v58  ;;  %v2600_v58 = vrot.slane %v2599_v54, 4 }
 0x113   : > { %v2605_v46 = vsel %vm4924_vm4, %v2600_v58, %v2604_v61 }
 0x116   : > { %4347 = vmatmul.mubr.msk.bf16.gmra.mrb[20].mxu0 %vm799_vm3, %v6150_v15 }
 0x117   : > { %4350 = vmatprep.mubr.msk.bf16.mxu0 %vm799_vm3, %v5286_v24  ;;  %v2595_v24 = vsel %vm4924_vm4, %v2590_v29, %v2594_v49 }
 0x118   : > { %4215 = vmatmul.mubr.msk.bf16.gmra.mrb[24].mxu1 %vm799_vm3, %v5521_v50  ;;  %v3826_v50 = vcombine.low %v2595_v24, %v2605_v46 }
 0x119   : > { %4218 = vmatprep.mubr.msk.bf16.mxu1 %vm799_vm3, %v5538_v19 }
 0x11e   : > { %4351 = vmatmul.mubr.msk.bf16.gmra.mrb[24].mxu0 %vm799_vm3, %v5307_v60  ;;  %v4758_v60 = vld [vmem:[%s6057_s3 + $0x8] sm:$0xff]  }
 0x11f   : > { %4354 = vmatprep.mubr.msk.bf16.mxu0 %vm799_vm3, %v5357_v4  ;;  %4394 = vmatprep.subr.bf16.mxu1 %v4758_v60  ;;  %v3843_v4 = vrot.slane %v5681_v38, 9 }
 0x120   : > { %4219 = vmatmul.mubr.msk.bf16.gmra.mrb[28].mxu1 %vm799_vm3, %v5562_v26 }
 0x121   : > { %4395 = vmatpush3.bf16.msra.mxu1 %v4758_v60 }
 0x126   : > { %4355 = vmatmul.mubr.msk.bf16.gmra.mrb[28].mxu0 %vm799_vm3, %v3826_v50 }
 0x127   : > { %4360 = vmatprep.mubr.msk.bf16.mxu0 %vm799_vm3, %v5344_v62  ;;  %v2813_v62 = vrot.slane %v5684_v43, 5 }
 0x12e   : > { %4361 = vmatmul.mubr.msk.bf16.vlgmr.msra.gmra.mrb[0].mxu0 %vm799_vm3, %v5366_v63  ;;  %v2815_v63 = vrot.slane %v2813_v62, 4 }
 0x12f   : > { %4364 = vmatprep.mubr.msk.bf16.mxu0 %vm799_vm3, %v5389_v48  ;;  %v2816_v48 = vrot.slane %v360_v5, 5 }
 0x136   : > { %4365 = vmatmul.mubr.msk.bf16.gmra.mrb[4].mxu0 %vm799_vm3, %v5404_v55  ;;  %v4759_v55 = vld [vmem:[%s6057_s3 + $0x10] sm:$0xff]  }
 0x137   : > { %4368 = vmatprep.mubr.msk.bf16.mxu0 %vm799_vm3, %v5413_v13  ;;  %4396 = vmatprep.subr.bf16.mxu1 %v4759_v55  ;;  %v2814_v13 = vsel %vm5292_vm7, %v3843_v4, %v2813_v62 }
 0x138   : > { %4397 = vmatpush3.bf16.msra.mxu1 %v4759_v55 }
 0x13e   : > { %4369 = vmatmul.mubr.msk.bf16.gmra.mrb[8].mxu0 %vm799_vm3, %v5437_v11  ;;  %v2817_v11 = vsel %vm5292_vm7, %v2815_v63, %v2816_v48 }
 0x13f   : > { %4372 = vmatprep.mubr.msk.bf16.mxu0 %vm799_vm3, %v5455_v28  ;;  %v3845_v28 = vcombine.low %v2814_v13, %v2817_v11 }
 0x146   : > { %4373 = vmatmul.mubr.msk.bf16.gmra.mrb[12].mxu0 %vm799_vm3, %v5468_v17  ;;  %v4760_v17 = vld [vmem:[%s6057_s3 + $0x18] sm:$0xff]  }
 0x147   : > { %4376 = vmatprep.mubr.msk.bf16.mxu0 %vm799_vm3, %v5485_v52  ;;  %4398 = vmatprep.subr.bf16.mxu1 %v4760_v17  ;;  %v4761_v52 = vld [vmem:[%s6057_s3 + $0x20] sm:$0xff]  }
 0x148   : > { %4399 = vmatpush3.bf16.msra.mxu1 %v4760_v17 }
 0x149   : > { %4400 = vmatprep.subr.bf16.mxu1 %v4761_v52 }
 0x14c   : > { %4401 = vmatpush3.bf16.msra.mxu1 %v4761_v52 }
 0x14d   : > { %4402 = vmatprep.subr.bf16.mxu1 %v4762_v51 }
 0x14e   : > { %4377 = vmatmul.mubr.msk.bf16.gmra.mrb[16].mxu0 %vm799_vm3, %v5500_v3  ;;  %v4763_v3 = vld [vmem:[%s6057_s3 + $0x30] ss:$0 sps:$4 sm:$0x33]  }
 0x14f   : > { %4380 = vmatprep.mubr.msk.bf16.mxu0 %vm799_vm3, %v5511_v22  ;;  %v3218_v22 = vsel %vm848_vm0, %v4763_v3, 0 }
 0x150   : > { %4403 = vmatpush3.bf16.msra.mxu1 %v4762_v51 }
 0x151   : > { %4703 = vmatprep.subr.msk.bf16.mxu1 %vm848_vm0, %v4763_v3 }
 0x154   : > { %4405 = vmatpush3.bf16.msra.mxu1 %v3218_v22 }
 0x156   : > { %4381 = vmatmul.mubr.msk.bf16.gmra.mrb[20].mxu0 %vm799_vm3, %v5532_v8 }
 0x157   : > { %4384 = vmatprep.mubr.msk.bf16.mxu0 %vm799_vm3, %v5548_v7 }
 0x15e   : > { %4385 = vmatmul.mubr.msk.bf16.gmra.mrb[24].mxu0 %vm799_vm3, %v5554_v25 }
 0x15f   : > { %4388 = vmatprep.mubr.msk.bf16.mxu0 %vm799_vm3, %v5571_v14 }
 0x166   : > { %4389 = vmatmul.mubr.msk.bf16.gmra.mrb[28].mxu0 %vm799_vm3, %v3845_v28 }
 0x1bb   : > { %v4192_v8 = vpop.f32.mrb[0].mxu1 }
 0x1bc   : > { %v1777_v19 = vpop.f32.mrb[1].mxu1 }
 0x1bd   : > { %v4193_v7 = vpop.f32.mrb[2].mxu1 }
 0x1be   : > { %v1780_v25 = vpop.f32.mrb[3].mxu1 }
 0x1c3   : > { %v4196_v26 = vpop.f32.mrb[4].mxu1 }
 0x1c4   : > { %v1793_v14 = vpop.f32.mrb[5].mxu1 }
 0x1c5   : > { %v4197_v45 = vpop.f32.mrb[6].mxu1 }
 0x1c6   : > { %v1796_v42 = vpop.f32.mrb[7].mxu1 }
 0x1cb   : > { %v5824_v1 = vpop.f32.mrb[8].mxu1 }
 0x1cc   : > { %v5826_v44 = vpop.f32.mrb[9].mxu1 }
 0x1cd   : > { %v5828_v53 = vpop.f32.mrb[10].mxu1 }
 0x1ce   : > { %v5830_v59 = vpop.f32.mrb[11].mxu1 }
 0x1d3   : > { %v5832_v36 = vpop.f32.mrb[12].mxu1 }
 0x1d4   : > { %v5834_v6 = vpop.f32.mrb[13].mxu1 }
 0x1d5   : > { %v5836_v34 = vpop.f32.mrb[14].mxu1 }
 0x1d6   : > { %v5838_v38 = vpop.f32.mrb[15].mxu1 }
 0x1db   : > { %v5840_v43 = vpop.f32.mrb[16].mxu1 }
 0x1dc   : > { %v5842_v40 = vpop.f32.mrb[17].mxu1 }
 0x1dd   : > { %v5844_v23 = vpop.f32.mrb[18].mxu1 }
 0x1de   : > { %v5846_v2 = vpop.f32.mrb[19].mxu1 }
 0x1e3   : > { %v5848_v30 = vpop.f32.mrb[20].mxu1 }
 0x1e4   : > { %v5850_v39 = vpop.f32.mrb[21].mxu1 }
 0x1e5   : > { %v5852_v20 = vpop.f32.mrb[22].mxu1 }
 0x1e6   : > { %v5854_v57 = vpop.f32.mrb[23].mxu1 }
 0x1eb   : > { %v5856_v9 = vpop.f32.mrb[24].mxu1 }
 0x1ec   : > { %v5858_v10 = vpop.f32.mrb[25].mxu1 }
 0x1ed   : > { %v5860_v16 = vpop.f32.mrb[26].mxu1 }
 0x1ee   : > { %v5862_v27 = vpop.f32.mrb[27].mxu1 }
 0x1f3   : > { %v5864_v33 = vpop.f32.mrb[28].mxu1 }
 0x1f4   : > { %v5866_v12 = vpop.f32.mrb[29].mxu1 }
 0x1f5   : > { %v5868_v47 = vpop.f32.mrb[30].mxu1 }
 0x1f6   : > { %v5870_v18 = vpop.f32.mrb[31].mxu1 }
 0x201   : > { %v4362_v0 = vpop.f32.mrb[0].mxu0 }
 0x202   : > { %v4438_v56 = vadd.f32 %v4362_v0, %v4192_v8  ;;  %v2863_v31 = vpop.f32.mrb[1].mxu0 }
 0x203   : > { %v4439_v49 = vadd.f32 %v2863_v31, %v1777_v19  ;;  %v4363_v37 = vpop.f32.mrb[2].mxu0 }
 0x204   : > { %v3031_v5 = vadd.f32 %v4438_v56, %v5875_v41  ;;  %v4440_v15 = vadd.f32 %v4363_v37, %v4193_v7  ;;  %v2866_v32 = vpop.f32.mrb[3].mxu0 }
 0x205   : > { %v3029_v54 = vadd.f32 %v4439_v49, %v5875_v41  ;;  %v4441_v21 = vadd.f32 %v2866_v32, %v1780_v25 }
 0x206   : > { %v3032_v29 = vadd.f32 %v4440_v15, %v5875_v41  ;;  %v3063_v61 = vmax.f32 %v3031_v5, 0.0 }
 0x207   : > { %v3030_v58 = vadd.f32 %v4441_v21, %v5875_v41  ;;  %v3061_v46 = vmax.f32 %v3029_v54, 0.0 }
 0x208   : > { %v3064_v24 = vmax.f32 %v3032_v29, 0.0 }
 0x209   : > { %v3062_v50 = vmax.f32 %v3030_v58, 0.0  ;;  %v4366_v35 = vpop.f32.mrb[4].mxu0 }
 0x20a   : > { %v3094_v60 = vpack.c.bf16 %v3064_v24, %v3063_v61  ;;  %v4442_v62 = vadd.f32 %v4366_v35, %v4196_v26  ;;  %v2879_v4 = vpop.f32.mrb[5].mxu0 }
 0x20b   : > { %v3093_v63 = vpack.c.bf16 %v3062_v50, %v3061_v46  ;;  %v4443_v48 = vadd.f32 %v2879_v4, %v1793_v14  ;;  %v4367_v55 = vpop.f32.mrb[6].mxu0 }
 0x20c   : > { %v3035_v13 = vadd.f32 %v4442_v62, %v5875_v41  ;;  %v4444_v11 = vadd.f32 %v4367_v55, %v4197_v45  ;;  %v2882_v28 = vpop.f32.mrb[7].mxu0 }
 0x20d   : > { %v3033_v17 = vadd.f32 %v4443_v48, %v5875_v41  ;;  %v4445_v52 = vadd.f32 %v2882_v28, %v1796_v42  ;;  %4406 = vmatprep.mubr.msk.bf16.mxu1 %vm3168_vm8, %v3093_v63 }
 0x20e   : > { %v3036_v51 = vadd.f32 %v4444_v11, %v5875_v41  ;;  %4407 = vmatmul.mubr.msk.bf16.vlgmr.msra.gmra.mrb[32].mxu1 %vm3168_vm8, %v3094_v60  ;;  %v3067_v22 = vmax.f32 %v3035_v13, 0.0 }
 0x20f   : > { %v3034_v3 = vadd.f32 %v4445_v52, %v5875_v41  ;;  %v3065_v19 = vmax.f32 %v3033_v17, 0.0 }
 0x210   : > { %v3068_v8 = vmax.f32 %v3036_v51, 0.0 }
 0x211   : > { %v3066_v7 = vmax.f32 %v3034_v3, 0.0  ;;  %v4370_v25 = vpop.f32.mrb[8].mxu0 }
 0x212   : > { %v3096_v26 = vpack.c.bf16 %v3068_v8, %v3067_v22  ;;  %v4446_v14 = vadd.f32 %v4370_v25, %v5824_v1  ;;  %v2895_v45 = vpop.f32.mrb[9].mxu0 }
 0x213   : > { %v3095_v0 = vpack.c.bf16 %v3066_v7, %v3065_v19  ;;  %v4447_v42 = vadd.f32 %v2895_v45, %v5826_v44  ;;  %v4371_v56 = vpop.f32.mrb[10].mxu0 }
 0x214   : > { %v3039_v31 = vadd.f32 %v4446_v14, %v5875_v41  ;;  %v4448_v49 = vadd.f32 %v4371_v56, %v5828_v53  ;;  %v2898_v37 = vpop.f32.mrb[11].mxu0 }
 0x215   : > { %v3037_v5 = vadd.f32 %v4447_v42, %v5875_v41  ;;  %v4449_v15 = vadd.f32 %v2898_v37, %v5830_v59  ;;  %4410 = vmatprep.mubr.msk.bf16.mxu1 %vm3168_vm8, %v3095_v0 }
 0x216   : > { %v3040_v32 = vadd.f32 %v4448_v49, %v5875_v41  ;;  %4411 = vmatmul.mubr.msk.bf16.gmra.mrb[36].mxu1 %vm3168_vm8, %v3096_v26  ;;  %v3071_v54 = vmax.f32 %v3039_v31, 0.0 }
 0x217   : > { %v3038_v1 = vadd.f32 %v4449_v15, %v5875_v41  ;;  %v3069_v21 = vmax.f32 %v3037_v5, 0.0 }
 0x218   : > { %v3072_v44 = vmax.f32 %v3040_v32, 0.0 }
 0x219   : > { %v3070_v29 = vmax.f32 %v3038_v1, 0.0  ;;  %v4374_v58 = vpop.f32.mrb[12].mxu0 }
 0x21a   : > { %v3098_v61 = vpack.c.bf16 %v3072_v44, %v3071_v54  ;;  %v4450_v53 = vadd.f32 %v4374_v58, %v5832_v36  ;;  %v2911_v24 = vpop.f32.mrb[13].mxu0 }
 0x21b   : > { %v3097_v46 = vpack.c.bf16 %v3070_v29, %v3069_v21  ;;  %v4451_v59 = vadd.f32 %v2911_v24, %v5834_v6  ;;  %v4375_v50 = vpop.f32.mrb[14].mxu0 }
 0x21c   : > { %v3043_v35 = vadd.f32 %v4450_v53, %v5875_v41  ;;  %v4452_v60 = vadd.f32 %v4375_v50, %v5836_v34  ;;  %v2914_v62 = vpop.f32.mrb[15].mxu0 }
 0x21d   : > { %v3041_v4 = vadd.f32 %v4451_v59, %v5875_v41  ;;  %v4453_v63 = vadd.f32 %v2914_v62, %v5838_v38  ;;  %4414 = vmatprep.mubr.msk.bf16.mxu1 %vm3168_vm8, %v3097_v46 }
 0x21e   : > { %v3044_v48 = vadd.f32 %v4452_v60, %v5875_v41  ;;  %4415 = vmatmul.mubr.msk.bf16.gmra.mrb[40].mxu1 %vm3168_vm8, %v3098_v61  ;;  %v3075_v55 = vmax.f32 %v3043_v35, 0.0 }
 0x21f   : > { %v3042_v36 = vadd.f32 %v4453_v63, %v5875_v41  ;;  %v3073_v13 = vmax.f32 %v3041_v4, 0.0 }
 0x220   : > { %v3076_v6 = vmax.f32 %v3044_v48, 0.0 }
 0x221   : > { %v3074_v11 = vmax.f32 %v3042_v36, 0.0  ;;  %v4378_v28 = vpop.f32.mrb[16].mxu0 }
 0x222   : > { %v3100_v17 = vpack.c.bf16 %v3076_v6, %v3075_v55  ;;  %v4454_v34 = vadd.f32 %v4378_v28, %v5840_v43  ;;  %v2927_v52 = vpop.f32.mrb[17].mxu0 }
 0x223   : > { %v3099_v51 = vpack.c.bf16 %v3074_v11, %v3073_v13  ;;  %v4455_v38 = vadd.f32 %v2927_v52, %v5842_v40  ;;  %v4379_v3 = vpop.f32.mrb[18].mxu0 }
 0x224   : > { %v3047_v22 = vadd.f32 %v4454_v34, %v5875_v41  ;;  %v4456_v8 = vadd.f32 %v4379_v3, %v5844_v23  ;;  %v2930_v19 = vpop.f32.mrb[19].mxu0 }
 0x225   : > { %v3045_v7 = vadd.f32 %v4455_v38, %v5875_v41  ;;  %v4457_v25 = vadd.f32 %v2930_v19, %v5846_v2  ;;  %4418 = vmatprep.mubr.msk.bf16.mxu1 %vm3168_vm8, %v3099_v51 }
 0x226   : > { %v3048_v26 = vadd.f32 %v4456_v8, %v5875_v41  ;;  %4419 = vmatmul.mubr.msk.bf16.gmra.mrb[44].mxu1 %vm3168_vm8, %v3100_v17  ;;  %v3079_v14 = vmax.f32 %v3047_v22, 0.0 }
 0x227   : > { %v3046_v43 = vadd.f32 %v4457_v25, %v5875_v41  ;;  %v3077_v45 = vmax.f32 %v3045_v7, 0.0 }
 0x228   : > { %v3080_v40 = vmax.f32 %v3048_v26, 0.0 }
 0x229   : > { %v3078_v0 = vmax.f32 %v3046_v43, 0.0  ;;  %v4382_v42 = vpop.f32.mrb[20].mxu0  ;;  %v3432_v43 = vld [vmem:[%s6060_s6 + $0x8] sm:$0x3] }
 0x22a   : > { %v3102_v56 = vpack.c.bf16 %v3080_v40, %v3079_v14  ;;  %v4458_v23 = vadd.f32 %v4382_v42, %v5848_v30  ;;  %v2943_v31 = vpop.f32.mrb[21].mxu0  ;;  %v5965_v14 = vld [vmem:[%s6058_s4] ss:$0 sm:$0xff] }
 0x22b   : > { %v3101_v49 = vpack.c.bf16 %v3078_v0, %v3077_v45  ;;  %v4459_v2 = vadd.f32 %v2943_v31, %v5850_v39  ;;  %v4383_v37 = vpop.f32.mrb[22].mxu0 }
 0x22c   : > { %v3051_v5 = vadd.f32 %v4458_v23, %v5875_v41  ;;  %v4460_v15 = vadd.f32 %v4383_v37, %v5852_v20  ;;  %v2946_v32 = vpop.f32.mrb[23].mxu0 }
 0x22d   : > { %v3049_v1 = vadd.f32 %v4459_v2, %v5875_v41  ;;  %v4461_v54 = vadd.f32 %v2946_v32, %v5854_v57  ;;  %4422 = vmatprep.mubr.msk.bf16.mxu1 %vm3168_vm8, %v3101_v49 }
 0x22e   : > { %v3052_v44 = vadd.f32 %v4460_v15, %v5875_v41  ;;  %4423 = vmatmul.mubr.msk.bf16.gmra.mrb[48].mxu1 %vm3168_vm8, %v3102_v56  ;;  %v3083_v21 = vmax.f32 %v3051_v5, 0.0 }
 0x22f   : > { %v3050_v30 = vadd.f32 %v4461_v54, %v5875_v41  ;;  %v3081_v29 = vmax.f32 %v3049_v1, 0.0 }
 0x230   : > { %v3084_v39 = vmax.f32 %v3052_v44, 0.0 }
 0x231   : > { %v3082_v58 = vmax.f32 %v3050_v30, 0.0  ;;  %v4386_v61 = vpop.f32.mrb[24].mxu0 }
 0x232   : > { %v3104_v53 = vpack.c.bf16 %v3084_v39, %v3083_v21  ;;  %v4462_v20 = vadd.f32 %v4386_v61, %v5856_v9  ;;  %v2959_v24 = vpop.f32.mrb[25].mxu0 }
 0x233   : > { %v3103_v46 = vpack.c.bf16 %v3082_v58, %v3081_v29  ;;  %v4463_v57 = vadd.f32 %v2959_v24, %v5858_v10  ;;  %v4387_v59 = vpop.f32.mrb[26].mxu0 }
 0x234   : > { %v3055_v50 = vadd.f32 %v4462_v20, %v5875_v41  ;;  %v4464_v35 = vadd.f32 %v4387_v59, %v5860_v16  ;;  %v2962_v60 = vpop.f32.mrb[27].mxu0 }
 0x235   : > { %v3053_v62 = vadd.f32 %v4463_v57, %v5875_v41  ;;  %v4465_v4 = vadd.f32 %v2962_v60, %v5862_v27  ;;  %4426 = vmatprep.mubr.msk.bf16.mxu1 %vm3168_vm8, %v3103_v46 }
 0x236   : > { %v3056_v63 = vadd.f32 %v4464_v35, %v5875_v41  ;;  %4427 = vmatmul.mubr.msk.bf16.gmra.mrb[52].mxu1 %vm3168_vm8, %v3104_v53  ;;  %v3087_v48 = vmax.f32 %v3055_v50, 0.0 }
 0x237   : > { %v3054_v9 = vadd.f32 %v4465_v4, %v5875_v41  ;;  %v3085_v36 = vmax.f32 %v3053_v62, 0.0 }
 0x238   : > { %v3088_v10 = vmax.f32 %v3056_v63, 0.0 }
 0x239   : > { %v3086_v55 = vmax.f32 %v3054_v9, 0.0  ;;  %v4390_v6 = vpop.f32.mrb[28].mxu0 }
 0x23a   : > { %v3106_v13 = vpack.c.bf16 %v3088_v10, %v3087_v48  ;;  %v4466_v16 = vadd.f32 %v4390_v6, %v5864_v33  ;;  %v2975_v11 = vpop.f32.mrb[29].mxu0 }
 0x23b   : > { %v3105_v28 = vpack.c.bf16 %v3086_v55, %v3085_v36  ;;  %v4467_v27 = vadd.f32 %v2975_v11, %v5866_v12  ;;  %v4391_v17 = vpop.f32.mrb[30].mxu0 }
 0x23c   : > { %v3059_v34 = vadd.f32 %v4466_v16, %v5875_v41  ;;  %v4468_v52 = vadd.f32 %v4391_v17, %v5868_v47  ;;  %v2978_v51 = vpop.f32.mrb[31].mxu0  ;;  %v5952_v47 = vld [vmem:[%s6059_s5] sm:$0x1f]  }
 0x23d   : > { %v3057_v38 = vadd.f32 %v4467_v27, %v5875_v41  ;;  %v4469_v3 = vadd.f32 %v2978_v51, %v5870_v18  ;;  %4430 = vmatprep.mubr.msk.bf16.mxu1 %vm3168_vm8, %v3105_v28  ;;  %v3431_v18 = vld [vmem:[%s6060_s6] sm:$0xff] }
 0x23e   : > { %v3060_v22 = vadd.f32 %v4468_v52, %v5875_v41  ;;  %4431 = vmatmul.mubr.msk.bf16.gmra.mrb[56].mxu1 %vm3168_vm8, %v3106_v13  ;;  %v3091_v8 = vmax.f32 %v3059_v34, 0.0 }
 0x23f   : > { %v3058_v33 = vadd.f32 %v4469_v3, %v5875_v41  ;;  %v3089_v19 = vmax.f32 %v3057_v38, 0.0  ;;  %v4792_v41 = vmov 0  }
 0x240   : > { %v3092_v12 = vmax.f32 %v3060_v22, 0.0  ;;  %4738 = vset.pattern.permute.xlu0 %v4792_v41 }
 0x241   : > { %v3090_v7 = vmax.f32 %v3058_v33, 0.0  ;;  %3435 = vperm.xlu0 %4738, %v3431_v18  }
 0x242   : > { %v3108_v25 = vpack.c.bf16 %v3092_v12, %v3091_v8 }
 0x243   : > { %v3107_v26 = vpack.c.bf16 %v3090_v7, %v3089_v19 }
 0x245   : > { %4434 = vmatprep.mubr.msk.bf16.mxu1 %vm3168_vm8, %v3107_v26  ;;  %3440 = vperm.xlu0 %4738, %v3432_v43  }
 0x246   : > { %4435 = vmatmul.mubr.msk.bf16.gmra.mrb[60].mxu1 %vm3168_vm8, %v3108_v25 }
 0x247   : > { %4084 = vmatprep.mubr.msk.bf16.mxu1 %vm3448_vm9, %v5952_v47 }
 0x2e1   : > { %v4408_v40 = vpop.f32.mrb[32].mxu1 }
 0x2e2   : > { %v3263_v45 = vadd.f32 %v4408_v40, %v5965_v14  ;;  %v3254_v0 = vpop.f32.mrb[33].mxu1 }
 0x2e3   : > { %v3255_v42 = vadd.f32 %v5965_v14, %v3254_v0  ;;  %v4409_v56 = vpop.f32.mrb[34].mxu1 }
 0x2e4   : > { %v3266_v23 = vadd.f32 %v4409_v56, %v5965_v14  ;;  %v3257_v31 = vpop.f32.mrb[35].mxu1  ;;  %v3383_v2 = vmax.f32 %v3263_v45, 0.0 }
 0x2e5   : > { %v3258_v49 = vadd.f32 %v5965_v14, %v3257_v31  ;;  %v3381_v5 = vmax.f32 %v3255_v42, 0.0 }
 0x2e6   : > { %v3384_v37 = vmax.f32 %v3266_v23, 0.0 }
 0x2e7   : > { %v3382_v15 = vmax.f32 %v3258_v49, 0.0 }
 0x2e8   : > { %v5971_v32 = vpack.c.bf16 %v3384_v37, %v3383_v2 }
 0x2e9   : > { %v5973_v1 = vpack.c.bf16 %v3382_v15, %v3381_v5  ;;  %v4412_v54 = vpop.f32.mrb[36].mxu1 }
 0x2ea   : > { %v3279_v44 = vadd.f32 %v4412_v54, %v5965_v14  ;;  %v3270_v30 = vpop.f32.mrb[37].mxu1 }
 0x2eb   : > { %v3271_v21 = vadd.f32 %v5965_v14, %v3270_v30  ;;  %v4413_v39 = vpop.f32.mrb[38].mxu1 }
 0x2ec   : > { %v3282_v29 = vadd.f32 %v4413_v39, %v5965_v14  ;;  %v3273_v58 = vpop.f32.mrb[39].mxu1  ;;  %v3387_v53 = vmax.f32 %v3279_v44, 0.0  ;;  %v3453_v44 = vsel %vm3448_vm9, %v5973_v1, 0 }
 0x2ed   : > { %v3274_v61 = vadd.f32 %v5965_v14, %v3273_v58  ;;  %v3385_v24 = vmax.f32 %v3271_v21, 0.0 }
 0x2ee   : > { %v3388_v20 = vmax.f32 %v3282_v29, 0.0 }
 0x2ef   : > { %v3386_v46 = vmax.f32 %v3274_v61, 0.0 }
 0x2f0   : > { %v5979_v57 = vpack.c.bf16 %v3388_v20, %v3387_v53 }
 0x2f1   : > { %v5981_v59 = vpack.c.bf16 %v3386_v46, %v3385_v24  ;;  %v4416_v50 = vpop.f32.mrb[40].mxu1 }
 0x2f2   : > { %v3295_v35 = vadd.f32 %v4416_v50, %v5965_v14  ;;  %v3286_v60 = vpop.f32.mrb[41].mxu1 }
 0x2f3   : > { %v3287_v62 = vadd.f32 %v5965_v14, %v3286_v60  ;;  %v4417_v4 = vpop.f32.mrb[42].mxu1 }
 0x2f4   : > { %v3298_v63 = vadd.f32 %v4417_v4, %v5965_v14  ;;  %v3289_v9 = vpop.f32.mrb[43].mxu1  ;;  %v3391_v10 = vmax.f32 %v3295_v35, 0.0 }
 0x2f5   : > { %v3290_v48 = vadd.f32 %v5965_v14, %v3289_v9  ;;  %v3389_v55 = vmax.f32 %v3287_v62, 0.0  ;;  %v3456_v62 = vsel %vm3448_vm9, %v5971_v32, 0 }
 0x2f6   : > { %v3392_v36 = vmax.f32 %v3298_v63, 0.0 }
 0x2f7   : > { %v3390_v6 = vmax.f32 %v3290_v48, 0.0 }
 0x2f8   : > { %v5987_v13 = vpack.c.bf16 %v3392_v36, %v3391_v10 }
 0x2f9   : > { %v5989_v16 = vpack.c.bf16 %v3390_v6, %v3389_v55  ;;  %v4420_v11 = vpop.f32.mrb[44].mxu1 }
 0x2fa   : > { %v3311_v28 = vadd.f32 %v4420_v11, %v5965_v14  ;;  %v3302_v27 = vpop.f32.mrb[45].mxu1 }
 0x2fb   : > { %v3303_v17 = vadd.f32 %v5965_v14, %v3302_v27  ;;  %v4421_v34 = vpop.f32.mrb[46].mxu1 }
 0x2fc   : > { %v3314_v52 = vadd.f32 %v4421_v34, %v5965_v14  ;;  %v3305_v51 = vpop.f32.mrb[47].mxu1  ;;  %v3395_v3 = vmax.f32 %v3311_v28, 0.0 }
 0x2fd   : > { %v3306_v38 = vadd.f32 %v5965_v14, %v3305_v51  ;;  %v3393_v33 = vmax.f32 %v3303_v17, 0.0 }
 0x2fe   : > { %v3396_v22 = vmax.f32 %v3314_v52, 0.0  ;;  %v3459_v52 = vsel %vm3448_vm9, %v5981_v59, 0  ;;  %v3465_v59 = vsel %vm3448_vm9, %v5989_v16, 0  ;;  %v3436_v16 = vpop.permute.xlu0 %3435 }
 0x2ff   : > { %v3394_v8 = vmax.f32 %v3306_v38, 0.0 }
 0x300   : > { %v5995_v12 = vpack.c.bf16 %v3396_v22, %v3395_v3 }
 0x301   : > { %v5997_v19 = vpack.c.bf16 %v3394_v8, %v3393_v33  ;;  %v4424_v7 = vpop.f32.mrb[48].mxu1 }
 0x302   : > { %v3327_v25 = vadd.f32 %v4424_v7, %v5965_v14  ;;  %v3318_v26 = vpop.f32.mrb[49].mxu1 }
 0x303   : > { %v3319_v18 = vadd.f32 %v5965_v14, %v3318_v26  ;;  %v4425_v41 = vpop.f32.mrb[50].mxu1 }
 0x304   : > { %v3330_v43 = vadd.f32 %v4425_v41, %v5965_v14  ;;  %v3321_v40 = vpop.f32.mrb[51].mxu1  ;;  %v3399_v0 = vmax.f32 %v3327_v25, 0.0  ;;  %v3471_v41 = vsel %vm3448_vm9, %v5997_v19, 0  ;;  %v3441_v19 = vpop.permute.xlu0 %3440 }
 0x305   : > { %v3322_v45 = vadd.f32 %v5965_v14, %v3321_v40  ;;  %v3397_v56 = vmax.f32 %v3319_v18, 0.0  ;;  %v3462_v18 = vsel %vm3448_vm9, %v5979_v57, 0  ;;  %v3474_v57 = vsel %vm3448_vm9, %v5995_v12, 0 }
 0x306   : > { %v3400_v42 = vmax.f32 %v3330_v43, 0.0 }
 0x307   : > { %v3398_v23 = vmax.f32 %v3322_v45, 0.0 }
 0x308   : > { %v3422_v31 = vpack.c.bf16 %v3400_v42, %v3399_v0 }
 0x309   : > { %v3421_v49 = vpack.c.bf16 %v3398_v23, %v3397_v56  ;;  %v4428_v2 = vpop.f32.mrb[52].mxu1 }
 0x30a   : > { %v3343_v37 = vadd.f32 %v4428_v2, %v5965_v14  ;;  %v3334_v5 = vpop.f32.mrb[53].mxu1 }
 0x30b   : > { %v3335_v15 = vadd.f32 %v5965_v14, %v3334_v5  ;;  %v4429_v54 = vpop.f32.mrb[54].mxu1  ;;  %4704 = vmatprep.subr.msk.bf16.mxu1 %vm3448_vm9, %v3421_v49 }
 0x30c   : > { %v3346_v30 = vadd.f32 %v4429_v54, %v5965_v14  ;;  %v3337_v21 = vpop.f32.mrb[55].mxu1  ;;  %4069 = vmatpush3.bf16.xpose.msra.mxu1 %v3453_v44  ;;  %v3403_v29 = vmax.f32 %v3343_v37, 0.0 }
 0x30d   : > { %v3338_v39 = vadd.f32 %v5965_v14, %v3337_v21  ;;  %4705 = vmatprep.subr.msk.bf16.mxu1 %vm3448_vm9, %v3422_v31  ;;  %v3401_v61 = vmax.f32 %v3335_v15, 0.0 }
 0x30e   : > { %v3404_v58 = vmax.f32 %v3346_v30, 0.0 }
 0x30f   : > { %v3402_v53 = vmax.f32 %v3338_v39, 0.0 }
 0x310   : > { %v3424_v20 = vpack.c.bf16 %v3404_v58, %v3403_v29 }
 0x311   : > { %v3423_v24 = vpack.c.bf16 %v3402_v53, %v3401_v61  ;;  %v4432_v46 = vpop.f32.mrb[56].mxu1 }
 0x312   : > { %v3359_v50 = vadd.f32 %v4432_v46, %v5965_v14  ;;  %v3350_v35 = vpop.f32.mrb[57].mxu1 }
 0x313   : > { %v3351_v1 = vadd.f32 %v5965_v14, %v3350_v35  ;;  %v4433_v60 = vpop.f32.mrb[58].mxu1 }
 0x314   : > { %v3362_v4 = vadd.f32 %v4433_v60, %v5965_v14  ;;  %v3353_v63 = vpop.f32.mrb[59].mxu1  ;;  %4071 = vmatpush3.bf16.xpose.msra.mxu1 %v3456_v62  ;;  %v3407_v48 = vmax.f32 %v3359_v50, 0.0 }
 0x315   : > { %v3354_v9 = vadd.f32 %v5965_v14, %v3353_v63  ;;  %4706 = vmatprep.subr.msk.bf16.mxu1 %vm3448_vm9, %v3423_v24  ;;  %v3405_v36 = vmax.f32 %v3351_v1, 0.0 }
 0x316   : > { %v3408_v10 = vmax.f32 %v3362_v4, 0.0 }
 0x317   : > { %v3406_v55 = vmax.f32 %v3354_v9, 0.0 }
 0x318   : > { %v3426_v6 = vpack.c.bf16 %v3408_v10, %v3407_v48 }
 0x319   : > { %v3425_v11 = vpack.c.bf16 %v3406_v55, %v3405_v36  ;;  %v4436_v28 = vpop.f32.mrb[60].mxu1 }
 0x31a   : > { %v3375_v27 = vadd.f32 %v4436_v28, %v5965_v14  ;;  %v3366_v17 = vpop.f32.mrb[61].mxu1 }
 0x31b   : > { %v3367_v32 = vadd.f32 %v5965_v14, %v3366_v17  ;;  %v4437_v34 = vpop.f32.mrb[62].mxu1 }
 0x31c   : > { %v3378_v51 = vadd.f32 %v4437_v34, %v5965_v14  ;;  %v3369_v38 = vpop.f32.mrb[63].mxu1  ;;  %4073 = vmatpush3.bf16.xpose.msra.mxu1 %v3459_v52  ;;  %v3411_v22 = vmax.f32 %v3375_v27, 0.0 }
 0x31d   : > { %v3370_v3 = vadd.f32 %v5965_v14, %v3369_v38  ;;  %4707 = vmatprep.subr.msk.bf16.mxu1 %vm3448_vm9, %v3424_v20  ;;  %v3409_v8 = vmax.f32 %v3367_v32, 0.0  ;;  %v3468_v14 = vsel %vm3448_vm9, %v5987_v13, 0 }
 0x31e   : > { %v3412_v33 = vmax.f32 %v3378_v51, 0.0 }
 0x31f   : > { %v3410_v7 = vmax.f32 %v3370_v3, 0.0 }
 0x320   : > { %v3428_v25 = vpack.c.bf16 %v3412_v33, %v3411_v22 }
 0x321   : > { %v3427_v26 = vpack.c.bf16 %v3410_v7, %v3409_v8 }
 0x324   : > { %4075 = vmatpush3.bf16.xpose.msra.mxu1 %v3462_v18 }
 0x325   : > { %4708 = vmatprep.subr.msk.bf16.mxu1 %vm3448_vm9, %v3425_v11 }
 0x32c   : > { %4077 = vmatpush3.bf16.xpose.msra.mxu1 %v3465_v59 }
 0x32d   : > { %4709 = vmatprep.subr.msk.bf16.mxu1 %vm3448_vm9, %v3426_v6 }
 0x334   : > { %4079 = vmatpush3.bf16.xpose.msra.mxu1 %v3468_v14 }
 0x335   : > { %4710 = vmatprep.subr.msk.bf16.mxu1 %vm3448_vm9, %v3427_v26 }
 0x33c   : > { %4081 = vmatpush3.bf16.xpose.msra.mxu1 %v3471_v41 }
 0x33d   : > { %4711 = vmatprep.subr.msk.bf16.mxu1 %vm3448_vm9, %v3428_v25 }
 0x344   : > { %4083 = vmatpush3.bf16.xpose.msra.mxu1 %v3474_v57 }
 0x34b   : > { %4085 = vmatmul.mubr.msk.bf16.vlgmr.msra.gmra.mrb[64].mxu1 %vm3448_vm9, %v5952_v47 }
 0x41e   : > { %v3534_v13 = vpop.f32.mrb[64].mxu1 }
 0x41f   : > { %v3535_v43 = vadd.f32 %v3534_v13, %v3436_v16  ;;  %v3536_v40 = vpop.f32.mrb[65].mxu1 }
 0x420   : > { %v3537_v45 = vadd.f32 %v3536_v40, %v3436_v16  ;;  %v3538_v0 = vpop.f32.mrb[66].mxu1 }
 0x421   : > { %3543 = vst [vmem:[%s300_s16] sm:$0xff] %v3535_v43  ;;  %v3539_v42 = vadd.f32 %v3538_v0, %v3441_v19  ;;  %v3540_v56 = vpop.f32.mrb[67].mxu1 }
 0x422   : > { %3544 = vst [vmem:[%s300_s16 + $0x8] sm:$0xff] %v3537_v45  ;;  %v3541_v12 = vadd.f32 %v3540_v56, %v3441_v19 }
 0x423   : > { %3545 = vst [vmem:[%s300_s16 + $0x10] sm:$0x3] %v3539_v42 }
 0x424   : > { %3546 = vst [vmem:[%s300_s16 + $0x18] sm:$0x3] %v3541_v12 }
 0x425 PF: > { %s17_s26 = sadd.s32 1, %s4790_s26   ;;  %s6151_s24 = smov %s4786_s25 }
 0x426   : > { %p14_p5 = scmp.ge.s32.totalorder %s17_s26, 4   ;;  %s6152_s25 = smov %s6154_s27 }
 0x428   :  { %16 = sbr.rel (!%p14_p5) target bundleno = 2 (0x2), region = 87 }

</bundles_post_ra>
